<compile_context>
chip_gen: v7x
topology: tpu7x:2x2x1
jax: 0.10.0
libtpu: 0.0.40
codegen_flags: <defaults>
</compile_context>

<pallas_src>
import functools
import math

import jax
import jax.numpy as jnp
from jax.experimental import pallas as pl
from jax.experimental.pallas import tpu as pltpu


def _layer_norm(x, gamma, beta, eps=1e-6):
    mean = jnp.mean(x, axis=-1, keepdims=True)
    var = jnp.mean(jnp.square(x - mean), axis=-1, keepdims=True)
    return (x - mean) * jax.lax.rsqrt(var + eps) * gamma + beta


def encoder_stack_kernel(x_ref, bias_ref,
                         wq_ref, wk_ref, wv_ref, wo_ref,
                         ln1_g_ref, ln1_b_ref,
                         w1_ref, b1_ref, w2_ref, b2_ref,
                         ln2_g_ref, ln2_b_ref,
                         out_ref, x_carry,
                         *, n_head, d_k, d_v, matmul_dtype):
    """Grid = (batch_block, layer). One step applies one encoder layer to one
    block of `bt` batch rows; the activation is carried across the layer axis
    in the f32 VMEM scratch `x_carry` (layer MUST be the innermost grid axis)."""
    layer = pl.program_id(1)
    num_layers = pl.num_programs(1)
    bt, S, D = x_carry.shape
    R = bt * S
    mm = matmul_dtype
    inv_temp = jnp.float32(1.0 / math.sqrt(d_k))

    @pl.when(layer == 0)
    def _():
        x_carry[...] = x_ref[...].astype(jnp.float32)

    x = x_carry[...].reshape(R, D)                  # f32 carried activation
    x_mm = x.astype(mm)
    bias = bias_ref[...].astype(jnp.float32)        # (bt, S, S) additive mask

    # ---------------- multi-head self-attention ----------------
    # Fused, lane-dense projections (N = n_head * d_k / d_v): full MXU columns,
    # no per-head lane-padded weight slabs.
    q_all = jnp.dot(x_mm, wq_ref[0].astype(mm),
                    preferred_element_type=jnp.float32)          # (R, H*d_k)
    k_all = jnp.dot(x_mm, wk_ref[0].astype(mm),
                    preferred_element_type=jnp.float32)          # (R, H*d_k)
    v_all = jnp.dot(x_mm, wv_ref[0].astype(mm),
                    preferred_element_type=jnp.float32)          # (R, H*d_v)

    q_all = (q_all * inv_temp).astype(mm).reshape(bt, S, n_head * d_k)
    k_all = k_all.astype(mm).reshape(bt, S, n_head * d_k)
    v_all = v_all.astype(mm).reshape(bt, S, n_head * d_v)

    ctx_heads = []
    for h in range(n_head):                          # static unrolled head loop
        qh = q_all[:, :, h * d_k:(h + 1) * d_k]      # (bt, S, d_k)
        kh = k_all[:, :, h * d_k:(h + 1) * d_k]
        vh = v_all[:, :, h * d_v:(h + 1) * d_v]

        scores = jnp.einsum('bqd,bkd->bqk', qh, kh,
                            preferred_element_type=jnp.float32) + bias
        scores = scores - jnp.max(scores, axis=-1, keepdims=True)
        p = jnp.exp(scores)                          # f32 softmax numerator
        probs = p * pl.reciprocal(jnp.sum(p, axis=-1, keepdims=True),
                                  approx=True)       # EUP, not VALU divide

        ctx_heads.append(jnp.einsum('bqk,bkd->bqd', probs.astype(mm), vh,
                                    preferred_element_type=jnp.float32))

    # Fused output projection: one K = n_head*d_v matmul on the concatenated
    # per-head contexts (no per-head K=d_v dots, no running VALU accumulate).
    ctx = jnp.concatenate(ctx_heads, axis=-1).reshape(R, n_head * d_v)
    attn = jnp.dot(ctx.astype(mm), wo_ref[0].astype(mm),
                   preferred_element_type=jnp.float32)           # (R, D)

    h1 = _layer_norm(attn + x, ln1_g_ref[0], ln1_b_ref[0])       # (R, D) f32

    # ---------------- position-wise feed-forward ----------------
    ff = jnp.dot(h1.astype(mm), w1_ref[0].astype(mm),
                 preferred_element_type=jnp.float32) + b1_ref[0]
    ff = jnp.maximum(ff, 0.0)
    ff = jnp.dot(ff.astype(mm), w2_ref[0].astype(mm),
                 preferred_element_type=jnp.float32) + b2_ref[0]
    h2 = _layer_norm(ff + h1, ln2_g_ref[0], ln2_b_ref[0])

    x_carry[...] = h2.reshape(bt, S, D)

    @pl.when(layer == num_layers - 1)
    def _():
        out_ref[...] = x_carry[...].astype(out_ref.dtype)


def encoder_layer_stack(x, mask, params, *, n_layers, n_head, d_k, d_v,
                        matmul_dtype=jnp.bfloat16, rows_target=256):
    B, S, D = x.shape
    d_inner = params['w1'].shape[-1]
    mm = matmul_dtype

    # ---- batch tiling: pack rows to fill the MXU, but keep >=2 parallel grid
    # steps when possible so both TensorCores of a v7x chip can get work.
    bt = max(1, rows_target // S)
    if B >= 2:
        bt = min(bt, max(1, B // 2))
    bt = min(bt, B)
    while B % bt:
        bt -= 1
    n_b = B // bt

    # ---- wrapper-side parameter prep:
    #  * attention weights stay in their natural lane-dense (D, H*d_k/d_v) and
    #    (H*d_v, D) layouts (fused projections, no per-head slabs).
    #  * matmul operands stored in `matmul_dtype` (halves weight DMA / VMEM).
    #  * LayerNorm / bias vectors as (L, 1, D) f32 rows.
    wq = params['wq'].astype(mm)            # (L, D, H*d_k)
    wk = params['wk'].astype(mm)            # (L, D, H*d_k)
    wv = params['wv'].astype(mm)            # (L, D, H*d_v)
    wo = params['wo'].astype(mm)            # (L, H*d_v, D)
    w1 = params['w1'].astype(mm)            # (L, D, d_inner)
    w2 = params['w2'].astype(mm)            # (L, d_inner, D)
    b1 = params['b1'].reshape(n_layers, 1, d_inner).astype(jnp.float32)
    b2 = params['b2'].reshape(n_layers, 1, D).astype(jnp.float32)
    ln1_g = params['ln1_g'].reshape(n_layers, 1, D).astype(jnp.float32)
    ln1_b = params['ln1_b'].reshape(n_layers, 1, D).astype(jnp.float32)
    ln2_g = params['ln2_g'].reshape(n_layers, 1, D).astype(jnp.float32)
    ln2_b = params['ln2_b'].reshape(n_layers, 1, D).astype(jnp.float32)

    # Additive attention bias computed once (hoists mask compare/select out of
    # the n_layers * n_head loops), shipped in bf16 (cast to f32 in-kernel).
    bias = jnp.where(mask != 0, 0.0, -1e9).astype(jnp.bfloat16)

    kernel = functools.partial(encoder_stack_kernel, n_head=n_head,
                               d_k=d_k, d_v=d_v, matmul_dtype=mm)

    in_specs = [
        pl.BlockSpec((bt, S, D), lambda b, l: (b, 0, 0)),                 # x
        pl.BlockSpec((bt, S, S), lambda b, l: (b, 0, 0)),                 # bias
        pl.BlockSpec((1, D, n_head * d_k), lambda b, l: (l, 0, 0)),       # wq
        pl.BlockSpec((1, D, n_head * d_k), lambda b, l: (l, 0, 0)),       # wk
        pl.BlockSpec((1, D, n_head * d_v), lambda b, l: (l, 0, 0)),       # wv
        pl.BlockSpec((1, n_head * d_v, D), lambda b, l: (l, 0, 0)),       # wo
        pl.BlockSpec((1, 1, D), lambda b, l: (l, 0, 0)),                  # ln1_g
        pl.BlockSpec((1, 1, D), lambda b, l: (l, 0, 0)),                  # ln1_b
        pl.BlockSpec((1, D, d_inner), lambda b, l: (l, 0, 0)),            # w1
        pl.BlockSpec((1, 1, d_inner), lambda b, l: (l, 0, 0)),            # b1
        pl.BlockSpec((1, d_inner, D), lambda b, l: (l, 0, 0)),            # w2
        pl.BlockSpec((1, 1, D), lambda b, l: (l, 0, 0)),                  # b2
        pl.BlockSpec((1, 1, D), lambda b, l: (l, 0, 0)),                  # ln2_g
        pl.BlockSpec((1, 1, D), lambda b, l: (l, 0, 0)),                  # ln2_b
    ]

    # ---- generation-aware scoped-VMEM budget.
    mm_size = jnp.dtype(mm).itemsize
    # one layer's lane-dense weight blocks (single buffer)
    w_block = ((D * n_head * (2 * d_k + d_v)          # wq + wk + wv
                + n_head * d_v * D                    # wo
                + 2 * D * d_inner) * mm_size          # w1 + w2
               + (d_inner + 5 * D) * 4)               # FFN biases + LN vectors
    # per-step activation blocks (single buffer)
    act_block = (2 * bt * S * D * x.dtype.itemsize    # x in + out
                 + bt * S * S * mm_size)              # bias (bf16)
    carry = bt * S * D * 4
    # in-kernel working set (dominant temporaries, one head's scores live)
    work = (bt * S * n_head * (2 * d_k + d_v) * (4 + mm_size)   # q/k/v f32+mm
            + 2 * bt * S * S * 4                                # scores, probs
            + bt * S * n_head * d_v * 4                         # concat ctx
            + bt * S * d_inner * 4)                             # FFN hidden
    est = 2 * (w_block + act_block) + carry + work + (4 << 20)
    try:
        vmem_cap = int(pltpu.get_tpu_info().vmem_capacity_bytes)
    except Exception:
        vmem_cap = 64 << 20                        # conservative (v7x) fallback
    vmem_limit = int(min(max(est, 32 << 20), int(vmem_cap * 0.85)))

    return pl.pallas_call(
        kernel,
        out_shape=jax.ShapeDtypeStruct((B, S, D), x.dtype),
        grid_spec=pltpu.PrefetchScalarGridSpec(
            num_scalar_prefetch=0,
            # layer axis MUST stay innermost: x_carry relies on all layers of a
            # batch block running consecutively.
            grid=(n_b, n_layers),
            in_specs=in_specs,
            out_specs=pl.BlockSpec((bt, S, D), lambda b, l: (b, 0, 0)),
            scratch_shapes=[pltpu.VMEM((bt, S, D), jnp.float32)],
        ),
        compiler_params=pltpu.CompilerParams(
            dimension_semantics=("parallel", "arbitrary"),
            vmem_limit_bytes=vmem_limit,
        ),
    )(x, bias, wq, wk, wv, wo, ln1_g, ln1_b, w1, b1, w2, b2, ln2_g, ln2_b)


# ------------------------- pure-JAX reference -------------------------
# Mirrors the kernel's mixed-precision policy (operands in `matmul_dtype`,
# f32 accumulation, f32 softmax / LayerNorm).  With matmul_dtype=f32 this is
# exactly the PyTorch module's f32 forward.
def reference(x, mask, params, *, n_layers, n_head, d_k, d_v,
              matmul_dtype=jnp.float32):
    B, S, D = x.shape
    mm = matmul_dtype
    inv_temp = 1.0 / math.sqrt(d_k)
    bias = jnp.where(mask != 0, 0.0, -1e9).astype(jnp.float32)[:, None]  # (B,1,S,S)
    h = x.astype(jnp.float32)
    for l in range(n_layers):
        res = h
        hm = h.astype(mm)
        q = jnp.dot(hm, params['wq'][l].astype(mm),
                    preferred_element_type=jnp.float32).reshape(B, S, n_head, d_k)
        k = jnp.dot(hm, params['wk'][l].astype(mm),
                    preferred_element_type=jnp.float32).reshape(B, S, n_head, d_k)
        v = jnp.dot(hm, params['wv'][l].astype(mm),
                    preferred_element_type=jnp.float32).reshape(B, S, n_head, d_v)
        q = q * inv_temp
        scores = jnp.einsum('bqhd,bkhd->bhqk', q.astype(mm), k.astype(mm),
                            preferred_element_type=jnp.float32) + bias
        probs = jax.nn.softmax(scores, axis=-1)
        ctx = jnp.einsum('bhqk,bkhd->bqhd', probs.astype(mm), v.astype(mm),
                         preferred_element_type=jnp.float32)
        ctx = ctx.reshape(B, S, n_head * d_v)
        attn = jnp.dot(ctx.astype(mm), params['wo'][l].astype(mm),
                       preferred_element_type=jnp.float32)
        h = _layer_norm(attn + res, params['ln1_g'][l], params['ln1_b'][l])
        res = h
        ff = jnp.dot(h.astype(mm), params['w1'][l].astype(mm),
                     preferred_element_type=jnp.float32) + params['b1'][l]
        ff = jnp.maximum(ff, 0.0)
        ff = jnp.dot(ff.astype(mm), params['w2'][l].astype(mm),
                     preferred_element_type=jnp.float32) + params['b2'][l]
        h = _layer_norm(ff + res, params['ln2_g'][l], params['ln2_b'][l])
    return h


if __name__ == "__main__":
    # Module hyperparameters (small, consistent with EncoderLayerStack.__init__).
    n_layers, n_head, d_k, d_v, d_model, d_inner = 2, 2, 16, 16, 32, 64
    B, S = 2, 8

    key = jax.random.PRNGKey(0)
    ks = jax.random.split(key, 16)
    s = 0.05

    # Weights stored as (in, out) so the kernel computes x @ W directly
    # (equivalent to PyTorch's x @ W_torch.T). Attention projections have no
    # bias (bias=False in the module); FFN linears have biases; LayerNorm eps=1e-6.
    params = dict(
        wq=jax.random.normal(ks[0], (n_layers, d_model, n_head * d_k), jnp.float32) * s,
        wk=jax.random.normal(ks[1], (n_layers, d_model, n_head * d_k), jnp.float32) * s,
        wv=jax.random.normal(ks[2], (n_layers, d_model, n_head * d_v), jnp.float32) * s,
        wo=jax.random.normal(ks[3], (n_layers, n_head * d_v, d_model), jnp.float32) * s,
        ln1_g=jnp.ones((n_layers, d_model), jnp.float32)
              + jax.random.normal(ks[4], (n_layers, d_model), jnp.float32) * 0.01,
        ln1_b=jax.random.normal(ks[5], (n_layers, d_model), jnp.float32) * 0.01,
        w1=jax.random.normal(ks[6], (n_layers, d_model, d_inner), jnp.float32) * s,
        b1=jax.random.normal(ks[7], (n_layers, d_inner), jnp.float32) * 0.01,
        w2=jax.random.normal(ks[8], (n_layers, d_inner, d_model), jnp.float32) * s,
        b2=jax.random.normal(ks[9], (n_layers, d_model), jnp.float32) * 0.01,
        ln2_g=jnp.ones((n_layers, d_model), jnp.float32)
              + jax.random.normal(ks[10], (n_layers, d_model), jnp.float32) * 0.01,
        ln2_b=jax.random.normal(ks[11], (n_layers, d_model), jnp.float32) * 0.01,
    )

    x = jax.random.normal(ks[12], (B, S, d_model), jnp.float32)
    # Attention mask: batch 1 cannot attend to the last two key positions.
    mask = jnp.ones((B, S, S), jnp.float32)
    mask = mask.at[1, :, 6:].set(0.0)

    # bf16 MXU operands with f32 accumulation (softmax/LayerNorm stay f32).
    mm_dtype = jnp.bfloat16

    out = encoder_layer_stack(x, mask, params, n_layers=n_layers, n_head=n_head,
                              d_k=d_k, d_v=d_v, matmul_dtype=mm_dtype)
    out = jax.block_until_ready(out)

    ref = reference(x, mask, params, n_layers=n_layers, n_head=n_head,
                    d_k=d_k, d_v=d_v, matmul_dtype=mm_dtype)
    assert out.shape == (B, S, d_model)
    max_err = jnp.max(jnp.abs(out - ref))
    assert jnp.allclose(out, ref, atol=3e-3, rtol=3e-3), \
        f"max abs err = {max_err}"

    print("KERNEL_OK")
</pallas_src>

<mosaic_0001>
module attributes {stable_mosaic.version = 11 : i64} {
  func.func @encoder_stack_kernel(%arg0: i32, %arg1: i32, %arg2: memref<1x8x32xf32, #tpu.memory_space<vmem>>, %arg3: memref<1x8x8xbf16, #tpu.memory_space<vmem>>, %arg4: memref<1x32x32xbf16, #tpu.memory_space<vmem>>, %arg5: memref<1x32x32xbf16, #tpu.memory_space<vmem>>, %arg6: memref<1x32x32xbf16, #tpu.memory_space<vmem>>, %arg7: memref<1x32x32xbf16, #tpu.memory_space<vmem>>, %arg8: memref<1x1x32xf32, #tpu.memory_space<vmem>>, %arg9: memref<1x1x32xf32, #tpu.memory_space<vmem>>, %arg10: memref<1x32x64xbf16, #tpu.memory_space<vmem>>, %arg11: memref<1x1x64xf32, #tpu.memory_space<vmem>>, %arg12: memref<1x64x32xbf16, #tpu.memory_space<vmem>>, %arg13: memref<1x1x32xf32, #tpu.memory_space<vmem>>, %arg14: memref<1x1x32xf32, #tpu.memory_space<vmem>>, %arg15: memref<1x1x32xf32, #tpu.memory_space<vmem>>, %arg16: memref<1x8x32xf32, #tpu.memory_space<vmem>>, %arg17: memref<1x8x32xf32, #tpu.memory_space<vmem>>) attributes {dimension_semantics = [#tpu.dimension_semantics<parallel>, #tpu.dimension_semantics<arbitrary>], iteration_bounds = array<i64: 2, 2>, scalar_prefetch = 0 : i64, scratch_operands = 1 : i64, tpu.core_type = #tpu.core_type<tc>, window_params = [{transform_indices = @transform_0, window_bounds = array<i64: 1, 8, 32>}, {transform_indices = @transform_1, window_bounds = array<i64: 1, 8, 8>}, {transform_indices = @transform_2, window_bounds = array<i64: 1, 32, 32>}, {transform_indices = @transform_3, window_bounds = array<i64: 1, 32, 32>}, {transform_indices = @transform_4, window_bounds = array<i64: 1, 32, 32>}, {transform_indices = @transform_5, window_bounds = array<i64: 1, 32, 32>}, {transform_indices = @transform_6, window_bounds = array<i64: 1, 1, 32>}, {transform_indices = @transform_7, window_bounds = array<i64: 1, 1, 32>}, {transform_indices = @transform_8, window_bounds = array<i64: 1, 32, 64>}, {transform_indices = @transform_9, window_bounds = array<i64: 1, 1, 64>}, {transform_indices = @transform_10, window_bounds = array<i64: 1, 64, 32>}, {transform_indices = @transform_11, window_bounds = array<i64: 1, 1, 32>}, {transform_indices = @transform_12, window_bounds = array<i64: 1, 1, 32>}, {transform_indices = @transform_13, window_bounds = array<i64: 1, 1, 32>}, {transform_indices = @transform_14, window_bounds = array<i64: 1, 8, 32>}]} {
    %c0_i32 = arith.constant 0 : i32
    %0 = arith.cmpi eq, %arg1, %c0_i32 : i32
    %1 = arith.extui %0 : i1 to i32
    %c0_i32_0 = arith.constant 0 : i32
    %2 = arith.cmpi ne, %1, %c0_i32_0 : i32
    scf.if %2 {
      %c0_71 = arith.constant 0 : index
      %c0_72 = arith.constant 0 : index
      %c0_73 = arith.constant 0 : index
      %142 = vector.load %arg2[%c0_71, %c0_72, %c0_73] : memref<1x8x32xf32, #tpu.memory_space<vmem>>, vector<1x8x32xf32>
      %c0_74 = arith.constant 0 : index
      %c0_75 = arith.constant 0 : index
      %c0_76 = arith.constant 0 : index
      %143 = vector.load %arg17[%c0_74, %c0_75, %c0_76] : memref<1x8x32xf32, #tpu.memory_space<vmem>>, vector<1x8x32xf32>
      tpu.vector_store %arg17[%c0_74, %c0_75, %c0_76], %142 {strides = array<i32>} : memref<1x8x32xf32, #tpu.memory_space<vmem>>, vector<1x8x32xf32>,
    } else {
    }
    %c0 = arith.constant 0 : index
    %c0_1 = arith.constant 0 : index
    %c0_2 = arith.constant 0 : index
    %3 = vector.load %arg17[%c0, %c0_1, %c0_2] : memref<1x8x32xf32, #tpu.memory_space<vmem>>, vector<1x8x32xf32>
    %4 = vector.shape_cast %3 : vector<1x8x32xf32> to vector<8x32xf32>
    %5 = arith.truncf %4 : vector<8x32xf32> to vector<8x32xbf16>
    %c0_3 = arith.constant 0 : index
    %c0_4 = arith.constant 0 : index
    %c0_5 = arith.constant 0 : index
    %6 = vector.load %arg3[%c0_3, %c0_4, %c0_5] : memref<1x8x8xbf16, #tpu.memory_space<vmem>>, vector<1x8x8xbf16>
    %7 = arith.extf %6 : vector<1x8x8xbf16> to vector<1x8x8xf32>
    %c0_6 = arith.constant 0 : index
    %c0_7 = arith.constant 0 : index
    %c0_8 = arith.constant 0 : index
    %8 = vector.load %arg4[%c0_6, %c0_7, %c0_8] : memref<1x32x32xbf16, #tpu.memory_space<vmem>>, vector<1x32x32xbf16>
    %9 = vector.shape_cast %8 : vector<1x32x32xbf16> to vector<32x32xbf16>
    %cst = arith.constant dense<0.000000e+00> : vector<8x32xf32>
    %10 = tpu.matmul %5, %9, %cst {dimension_numbers = #tpu.dot_dimension_numbers<[1], [0], [0], [1], [0, 0, 1, 1], [], []>} : vector<8x32xbf16>, vector<32x32xbf16>, vector<8x32xf32> -> vector<8x32xf32>
    %c0_9 = arith.constant 0 : index
    %c0_10 = arith.constant 0 : index
    %c0_11 = arith.constant 0 : index
    %11 = vector.load %arg5[%c0_9, %c0_10, %c0_11] : memref<1x32x32xbf16, #tpu.memory_space<vmem>>, vector<1x32x32xbf16>
    %12 = vector.shape_cast %11 : vector<1x32x32xbf16> to vector<32x32xbf16>
    %cst_12 = arith.constant dense<0.000000e+00> : vector<8x32xf32>
    %13 = tpu.matmul %5, %12, %cst_12 {dimension_numbers = #tpu.dot_dimension_numbers<[1], [0], [0], [1], [0, 0, 1, 1], [], []>} : vector<8x32xbf16>, vector<32x32xbf16>, vector<8x32xf32> -> vector<8x32xf32>
    %c0_13 = arith.constant 0 : index
    %c0_14 = arith.constant 0 : index
    %c0_15 = arith.constant 0 : index
    %14 = vector.load %arg6[%c0_13, %c0_14, %c0_15] : memref<1x32x32xbf16, #tpu.memory_space<vmem>>, vector<1x32x32xbf16>
    %15 = vector.shape_cast %14 : vector<1x32x32xbf16> to vector<32x32xbf16>
    %cst_16 = arith.constant dense<0.000000e+00> : vector<8x32xf32>
    %16 = tpu.matmul %5, %15, %cst_16 {dimension_numbers = #tpu.dot_dimension_numbers<[1], [0], [0], [1], [0, 0, 1, 1], [], []>} : vector<8x32xbf16>, vector<32x32xbf16>, vector<8x32xf32> -> vector<8x32xf32>
    %cst_17 = arith.constant 2.500000e-01 : f32
    %17 = vector.broadcast %cst_17 : f32 to vector<8x32xf32>
    %18 = arith.mulf %10, %17 : vector<8x32xf32>
    %19 = arith.truncf %18 : vector<8x32xf32> to vector<8x32xbf16>
    %20 = vector.shape_cast %19 : vector<8x32xbf16> to vector<1x8x32xbf16>
    %21 = arith.truncf %13 : vector<8x32xf32> to vector<8x32xbf16>
    %22 = vector.shape_cast %21 : vector<8x32xbf16> to vector<1x8x32xbf16>
    %23 = arith.truncf %16 : vector<8x32xf32> to vector<8x32xbf16>
    %24 = vector.shape_cast %23 : vector<8x32xbf16> to vector<1x8x32xbf16>
    %25 = vector.extract_strided_slice %20 {offsets = [0, 0, 0], sizes = [1, 8, 16], strides = [1, 1, 1]} : vector<1x8x32xbf16> to vector<1x8x16xbf16>
    %26 = vector.extract_strided_slice %22 {offsets = [0, 0, 0], sizes = [1, 8, 16], strides = [1, 1, 1]} : vector<1x8x32xbf16> to vector<1x8x16xbf16>
    %27 = vector.extract_strided_slice %24 {offsets = [0, 0, 0], sizes = [1, 8, 16], strides = [1, 1, 1]} : vector<1x8x32xbf16> to vector<1x8x16xbf16>
    "tpu.trace_start"() <{level = 10 : i32, message = "bqd,bkd->bqk"}> : () -> ()
    %cst_18 = arith.constant dense<0.000000e+00> : vector<1x8x8xf32>
    %28 = tpu.matmul %25, %26, %cst_18 {dimension_numbers = #tpu.dot_dimension_numbers<[2], [2], [1], [1], [0, 0, 0, 1, 1, 1], [0], [0]>} : vector<1x8x16xbf16>, vector<1x8x16xbf16>, vector<1x8x8xf32> -> vector<1x8x8xf32>
    "tpu.trace_stop"() : () -> ()
    %29 = arith.addf %28, %7 : vector<1x8x8xf32>
    %cst_19 = arith.constant dense<0xFF800000> : vector<1x8xf32>
    %30 = vector.multi_reduction <maximumf>, %29, %cst_19 [2] : vector<1x8x8xf32> to vector<1x8xf32>
    %31 = vector.shape_cast %30 : vector<1x8xf32> to vector<1x8x1xf32>
    %32 = vector.broadcast %31 : vector<1x8x1xf32> to vector<1x8x8xf32>
    %33 = arith.subf %29, %32 : vector<1x8x8xf32>
    %34 = math.exp %33 : vector<1x8x8xf32>
    %cst_20 = arith.constant dense<0.000000e+00> : vector<1x8xf32>
    %35 = vector.multi_reduction <add>, %34, %cst_20 [2] : vector<1x8x8xf32> to vector<1x8xf32>
    %36 = vector.shape_cast %35 : vector<1x8xf32> to vector<1x8x1xf32>
    %37 = tpu.reciprocal %36 {approx = true} : vector<1x8x1xf32> -> vector<1x8x1xf32>
    %38 = vector.broadcast %37 : vector<1x8x1xf32> to vector<1x8x8xf32>
    %39 = arith.mulf %34, %38 : vector<1x8x8xf32>
    %40 = arith.truncf %39 : vector<1x8x8xf32> to vector<1x8x8xbf16>
    "tpu.trace_start"() <{level = 10 : i32, message = "bqk,bkd->bqd"}> : () -> ()
    %cst_21 = arith.constant dense<0.000000e+00> : vector<1x8x16xf32>
    %41 = tpu.matmul %40, %27, %cst_21 {dimension_numbers = #tpu.dot_dimension_numbers<[2], [1], [1], [2], [0, 0, 0, 1, 1, 2], [0], [0]>} : vector<1x8x8xbf16>, vector<1x8x16xbf16>, vector<1x8x16xf32> -> vector<1x8x16xf32>
    "tpu.trace_stop"() : () -> ()
    %42 = vector.extract_strided_slice %20 {offsets = [0, 0, 16], sizes = [1, 8, 16], strides = [1, 1, 1]} : vector<1x8x32xbf16> to vector<1x8x16xbf16>
    %43 = vector.extract_strided_slice %22 {offsets = [0, 0, 16], sizes = [1, 8, 16], strides = [1, 1, 1]} : vector<1x8x32xbf16> to vector<1x8x16xbf16>
    %44 = vector.extract_strided_slice %24 {offsets = [0, 0, 16], sizes = [1, 8, 16], strides = [1, 1, 1]} : vector<1x8x32xbf16> to vector<1x8x16xbf16>
    "tpu.trace_start"() <{level = 10 : i32, message = "bqd,bkd->bqk"}> : () -> ()
    %cst_22 = arith.constant dense<0.000000e+00> : vector<1x8x8xf32>
    %45 = tpu.matmul %42, %43, %cst_22 {dimension_numbers = #tpu.dot_dimension_numbers<[2], [2], [1], [1], [0, 0, 0, 1, 1, 1], [0], [0]>} : vector<1x8x16xbf16>, vector<1x8x16xbf16>, vector<1x8x8xf32> -> vector<1x8x8xf32>
    "tpu.trace_stop"() : () -> ()
    %46 = arith.addf %45, %7 : vector<1x8x8xf32>
    %cst_23 = arith.constant dense<0xFF800000> : vector<1x8xf32>
    %47 = vector.multi_reduction <maximumf>, %46, %cst_23 [2] : vector<1x8x8xf32> to vector<1x8xf32>
    %48 = vector.shape_cast %47 : vector<1x8xf32> to vector<1x8x1xf32>
    %49 = vector.broadcast %48 : vector<1x8x1xf32> to vector<1x8x8xf32>
    %50 = arith.subf %46, %49 : vector<1x8x8xf32>
    %51 = math.exp %50 : vector<1x8x8xf32>
    %cst_24 = arith.constant dense<0.000000e+00> : vector<1x8xf32>
    %52 = vector.multi_reduction <add>, %51, %cst_24 [2] : vector<1x8x8xf32> to vector<1x8xf32>
    %53 = vector.shape_cast %52 : vector<1x8xf32> to vector<1x8x1xf32>
    %54 = tpu.reciprocal %53 {approx = true} : vector<1x8x1xf32> -> vector<1x8x1xf32>
    %55 = vector.broadcast %54 : vector<1x8x1xf32> to vector<1x8x8xf32>
    %56 = arith.mulf %51, %55 : vector<1x8x8xf32>
    %57 = arith.truncf %56 : vector<1x8x8xf32> to vector<1x8x8xbf16>
    "tpu.trace_start"() <{level = 10 : i32, message = "bqk,bkd->bqd"}> : () -> ()
    %cst_25 = arith.constant dense<0.000000e+00> : vector<1x8x16xf32>
    %58 = tpu.matmul %57, %44, %cst_25 {dimension_numbers = #tpu.dot_dimension_numbers<[2], [1], [1], [2], [0, 0, 0, 1, 1, 2], [0], [0]>} : vector<1x8x8xbf16>, vector<1x8x16xbf16>, vector<1x8x16xf32> -> vector<1x8x16xf32>
    "tpu.trace_stop"() : () -> ()
    %59 = tpu.concatenate %41, %58 in 2 : vector<1x8x16xf32>, vector<1x8x16xf32> -> vector<1x8x32xf32>
    %60 = vector.shape_cast %59 : vector<1x8x32xf32> to vector<8x32xf32>
    %61 = arith.truncf %60 : vector<8x32xf32> to vector<8x32xbf16>
    %c0_26 = arith.constant 0 : index
    %c0_27 = arith.constant 0 : index
    %c0_28 = arith.constant 0 : index
    %62 = vector.load %arg7[%c0_26, %c0_27, %c0_28] : memref<1x32x32xbf16, #tpu.memory_space<vmem>>, vector<1x32x32xbf16>
    %63 = vector.shape_cast %62 : vector<1x32x32xbf16> to vector<32x32xbf16>
    %cst_29 = arith.constant dense<0.000000e+00> : vector<8x32xf32>
    %64 = tpu.matmul %61, %63, %cst_29 {dimension_numbers = #tpu.dot_dimension_numbers<[1], [0], [0], [1], [0, 0, 1, 1], [], []>} : vector<8x32xbf16>, vector<32x32xbf16>, vector<8x32xf32> -> vector<8x32xf32>
    %65 = arith.addf %64, %4 : vector<8x32xf32>
    %c0_30 = arith.constant 0 : index
    %c0_31 = arith.constant 0 : index
    %c0_32 = arith.constant 0 : index
    %66 = vector.load %arg8[%c0_30, %c0_31, %c0_32] : memref<1x1x32xf32, #tpu.memory_space<vmem>>, vector<1x1x32xf32>
    %67 = vector.shape_cast %66 : vector<1x1x32xf32> to vector<1x32xf32>
    %c0_33 = arith.constant 0 : index
    %c0_34 = arith.constant 0 : index
    %c0_35 = arith.constant 0 : index
    %68 = vector.load %arg9[%c0_33, %c0_34, %c0_35] : memref<1x1x32xf32, #tpu.memory_space<vmem>>, vector<1x1x32xf32>
    %69 = vector.shape_cast %68 : vector<1x1x32xf32> to vector<1x32xf32>
    %cst_36 = arith.constant dense<0.000000e+00> : vector<8xf32>
    %70 = vector.multi_reduction <add>, %65, %cst_36 [1] : vector<8x32xf32> to vector<8xf32>
    %71 = vector.shape_cast %70 : vector<8xf32> to vector<8x1xf32>
    %cst_37 = arith.constant 3.200000e+01 : f32
    %72 = vector.broadcast %cst_37 : f32 to vector<8x1xf32>
    %73 = arith.divf %71, %72 : vector<8x1xf32>
    %74 = vector.broadcast %73 : vector<8x1xf32> to vector<8x32xf32>
    %75 = arith.subf %65, %74 : vector<8x32xf32>
    %76 = arith.mulf %75, %75 : vector<8x32xf32>
    %cst_38 = arith.constant dense<0.000000e+00> : vector<8xf32>
    %77 = vector.multi_reduction <add>, %76, %cst_38 [1] : vector<8x32xf32> to vector<8xf32>
    %78 = vector.shape_cast %77 : vector<8xf32> to vector<8x1xf32>
    %cst_39 = arith.constant 3.200000e+01 : f32
    %79 = vector.broadcast %cst_39 : f32 to vector<8x1xf32>
    %80 = arith.divf %78, %79 : vector<8x1xf32>
    %81 = vector.broadcast %73 : vector<8x1xf32> to vector<8x32xf32>
    %82 = arith.subf %65, %81 : vector<8x32xf32>
    %cst_40 = arith.constant 9.99999997E-7 : f32
    %83 = vector.broadcast %cst_40 : f32 to vector<8x1xf32>
    %84 = arith.addf %80, %83 : vector<8x1xf32>
    %85 = math.rsqrt %84 : vector<8x1xf32>
    %86 = vector.broadcast %85 : vector<8x1xf32> to vector<8x32xf32>
    %87 = arith.mulf %82, %86 : vector<8x32xf32>
    %88 = vector.broadcast %67 : vector<1x32xf32> to vector<8x32xf32>
    %89 = arith.mulf %87, %88 : vector<8x32xf32>
    %90 = vector.broadcast %69 : vector<1x32xf32> to vector<8x32xf32>
    %91 = arith.addf %89, %90 : vector<8x32xf32>
    %92 = arith.truncf %91 : vector<8x32xf32> to vector<8x32xbf16>
    %c0_41 = arith.constant 0 : index
    %c0_42 = arith.constant 0 : index
    %c0_43 = arith.constant 0 : index
    %93 = vector.load %arg10[%c0_41, %c0_42, %c0_43] : memref<1x32x64xbf16, #tpu.memory_space<vmem>>, vector<1x32x64xbf16>
    %94 = vector.shape_cast %93 : vector<1x32x64xbf16> to vector<32x64xbf16>
    %cst_44 = arith.constant dense<0.000000e+00> : vector<8x64xf32>
    %95 = tpu.matmul %92, %94, %cst_44 {dimension_numbers = #tpu.dot_dimension_numbers<[1], [0], [0], [1], [0, 0, 1, 1], [], []>} : vector<8x32xbf16>, vector<32x64xbf16>, vector<8x64xf32> -> vector<8x64xf32>
    %c0_45 = arith.constant 0 : index
    %c0_46 = arith.constant 0 : index
    %c0_47 = arith.constant 0 : index
    %96 = vector.load %arg11[%c0_45, %c0_46, %c0_47] : memref<1x1x64xf32, #tpu.memory_space<vmem>>, vector<1x1x64xf32>
    %97 = vector.shape_cast %96 : vector<1x1x64xf32> to vector<1x64xf32>
    %98 = vector.broadcast %97 : vector<1x64xf32> to vector<8x64xf32>
    %99 = arith.addf %95, %98 : vector<8x64xf32>
    %cst_48 = arith.constant 0.000000e+00 : f32
    %100 = vector.broadcast %cst_48 : f32 to vector<8x64xf32>
    %101 = arith.maximumf %99, %100 : vector<8x64xf32>
    %102 = arith.truncf %101 : vector<8x64xf32> to vector<8x64xbf16>
    %c0_49 = arith.constant 0 : index
    %c0_50 = arith.constant 0 : index
    %c0_51 = arith.constant 0 : index
    %103 = vector.load %arg12[%c0_49, %c0_50, %c0_51] : memref<1x64x32xbf16, #tpu.memory_space<vmem>>, vector<1x64x32xbf16>
    %104 = vector.shape_cast %103 : vector<1x64x32xbf16> to vector<64x32xbf16>
    %cst_52 = arith.constant dense<0.000000e+00> : vector<8x32xf32>
    %105 = tpu.matmul %102, %104, %cst_52 {dimension_numbers = #tpu.dot_dimension_numbers<[1], [0], [0], [1], [0, 0, 1, 1], [], []>} : vector<8x64xbf16>, vector<64x32xbf16>, vector<8x32xf32> -> vector<8x32xf32>
    %c0_53 = arith.constant 0 : index
    %c0_54 = arith.constant 0 : index
    %c0_55 = arith.constant 0 : index
    %106 = vector.load %arg13[%c0_53, %c0_54, %c0_55] : memref<1x1x32xf32, #tpu.memory_space<vmem>>, vector<1x1x32xf32>
    %107 = vector.shape_cast %106 : vector<1x1x32xf32> to vector<1x32xf32>
    %108 = vector.broadcast %107 : vector<1x32xf32> to vector<8x32xf32>
    %109 = arith.addf %105, %108 : vector<8x32xf32>
    %110 = arith.addf %109, %91 : vector<8x32xf32>
    %c0_56 = arith.constant 0 : index
    %c0_57 = arith.constant 0 : index
    %c0_58 = arith.constant 0 : index
    %111 = vector.load %arg14[%c0_56, %c0_57, %c0_58] : memref<1x1x32xf32, #tpu.memory_space<vmem>>, vector<1x1x32xf32>
    %112 = vector.shape_cast %111 : vector<1x1x32xf32> to vector<1x32xf32>
    %c0_59 = arith.constant 0 : index
    %c0_60 = arith.constant 0 : index
    %c0_61 = arith.constant 0 : index
    %113 = vector.load %arg15[%c0_59, %c0_60, %c0_61] : memref<1x1x32xf32, #tpu.memory_space<vmem>>, vector<1x1x32xf32>
    %114 = vector.shape_cast %113 : vector<1x1x32xf32> to vector<1x32xf32>
    %cst_62 = arith.constant dense<0.000000e+00> : vector<8xf32>
    %115 = vector.multi_reduction <add>, %110, %cst_62 [1] : vector<8x32xf32> to vector<8xf32>
    %116 = vector.shape_cast %115 : vector<8xf32> to vector<8x1xf32>
    %cst_63 = arith.constant 3.200000e+01 : f32
    %117 = vector.broadcast %cst_63 : f32 to vector<8x1xf32>
    %118 = arith.divf %116, %117 : vector<8x1xf32>
    %119 = vector.broadcast %118 : vector<8x1xf32> to vector<8x32xf32>
    %120 = arith.subf %110, %119 : vector<8x32xf32>
    %121 = arith.mulf %120, %120 : vector<8x32xf32>
    %cst_64 = arith.constant dense<0.000000e+00> : vector<8xf32>
    %122 = vector.multi_reduction <add>, %121, %cst_64 [1] : vector<8x32xf32> to vector<8xf32>
    %123 = vector.shape_cast %122 : vector<8xf32> to vector<8x1xf32>
    %cst_65 = arith.constant 3.200000e+01 : f32
    %124 = vector.broadcast %cst_65 : f32 to vector<8x1xf32>
    %125 = arith.divf %123, %124 : vector<8x1xf32>
    %126 = vector.broadcast %118 : vector<8x1xf32> to vector<8x32xf32>
    %127 = arith.subf %110, %126 : vector<8x32xf32>
    %cst_66 = arith.constant 9.99999997E-7 : f32
    %128 = vector.broadcast %cst_66 : f32 to vector<8x1xf32>
    %129 = arith.addf %125, %128 : vector<8x1xf32>
    %130 = math.rsqrt %129 : vector<8x1xf32>
    %131 = vector.broadcast %130 : vector<8x1xf32> to vector<8x32xf32>
    %132 = arith.mulf %127, %131 : vector<8x32xf32>
    %133 = vector.broadcast %112 : vector<1x32xf32> to vector<8x32xf32>
    %134 = arith.mulf %132, %133 : vector<8x32xf32>
    %135 = vector.broadcast %114 : vector<1x32xf32> to vector<8x32xf32>
    %136 = arith.addf %134, %135 : vector<8x32xf32>
    %137 = vector.shape_cast %136 : vector<8x32xf32> to vector<1x8x32xf32>
    %c0_67 = arith.constant 0 : index
    %c0_68 = arith.constant 0 : index
    %c0_69 = arith.constant 0 : index
    %138 = vector.load %arg17[%c0_67, %c0_68, %c0_69] : memref<1x8x32xf32, #tpu.memory_space<vmem>>, vector<1x8x32xf32>
    tpu.vector_store %arg17[%c0_67, %c0_68, %c0_69], %137 {strides = array<i32>} : memref<1x8x32xf32, #tpu.memory_space<vmem>>, vector<1x8x32xf32>,
    %c1_i32 = arith.constant 1 : i32
    %139 = arith.cmpi eq, %arg1, %c1_i32 : i32
    %140 = arith.extui %139 : i1 to i32
    %c0_i32_70 = arith.constant 0 : i32
    %141 = arith.cmpi ne, %140, %c0_i32_70 : i32
    scf.if %141 {
      %c0_71 = arith.constant 0 : index
      %c0_72 = arith.constant 0 : index
      %c0_73 = arith.constant 0 : index
      %142 = vector.load %arg17[%c0_71, %c0_72, %c0_73] : memref<1x8x32xf32, #tpu.memory_space<vmem>>, vector<1x8x32xf32>
      %c0_74 = arith.constant 0 : index
      %c0_75 = arith.constant 0 : index
      %c0_76 = arith.constant 0 : index
      %143 = vector.load %arg16[%c0_74, %c0_75, %c0_76] : memref<1x8x32xf32, #tpu.memory_space<vmem>>, vector<1x8x32xf32>
      tpu.vector_store %arg16[%c0_74, %c0_75, %c0_76], %142 {strides = array<i32>} : memref<1x8x32xf32, #tpu.memory_space<vmem>>, vector<1x8x32xf32>,
    } else {
    }
    return
  }
  func.func @transform_0(%arg0: i32, %arg1: i32) -> (i32, i32, i32) {
    %c0_i32 = arith.constant 0 : i32
    %c0_i32_0 = arith.constant 0 : i32
    %c0_i32_1 = arith.constant 0 : i32
    return %arg0, %c0_i32, %c0_i32_0 : i32, i32, i32
  }
  func.func @transform_1(%arg0: i32, %arg1: i32) -> (i32, i32, i32) {
    %c0_i32 = arith.constant 0 : i32
    %c0_i32_0 = arith.constant 0 : i32
    %c0_i32_1 = arith.constant 0 : i32
    return %arg0, %c0_i32, %c0_i32_0 : i32, i32, i32
  }
  func.func @transform_2(%arg0: i32, %arg1: i32) -> (i32, i32, i32) {
    %c0_i32 = arith.constant 0 : i32
    %c0_i32_0 = arith.constant 0 : i32
    %c0_i32_1 = arith.constant 0 : i32
    return %arg1, %c0_i32, %c0_i32_0 : i32, i32, i32
  }
  func.func @transform_3(%arg0: i32, %arg1: i32) -> (i32, i32, i32) {
    %c0_i32 = arith.constant 0 : i32
    %c0_i32_0 = arith.constant 0 : i32
    %c0_i32_1 = arith.constant 0 : i32
    return %arg1, %c0_i32, %c0_i32_0 : i32, i32, i32
  }
  func.func @transform_4(%arg0: i32, %arg1: i32) -> (i32, i32, i32) {
    %c0_i32 = arith.constant 0 : i32
    %c0_i32_0 = arith.constant 0 : i32
    %c0_i32_1 = arith.constant 0 : i32
    return %arg1, %c0_i32, %c0_i32_0 : i32, i32, i32
  }
  func.func @transform_5(%arg0: i32, %arg1: i32) -> (i32, i32, i32) {
    %c0_i32 = arith.constant 0 : i32
    %c0_i32_0 = arith.constant 0 : i32
    %c0_i32_1 = arith.constant 0 : i32
    return %arg1, %c0_i32, %c0_i32_0 : i32, i32, i32
  }
  func.func @transform_6(%arg0: i32, %arg1: i32) -> (i32, i32, i32) {
    %c0_i32 = arith.constant 0 : i32
    %c0_i32_0 = arith.constant 0 : i32
    %c0_i32_1 = arith.constant 0 : i32
    return %arg1, %c0_i32, %c0_i32_0 : i32, i32, i32
  }
  func.func @transform_7(%arg0: i32, %arg1: i32) -> (i32, i32, i32) {
    %c0_i32 = arith.constant 0 : i32
    %c0_i32_0 = arith.constant 0 : i32
    %c0_i32_1 = arith.constant 0 : i32
    return %arg1, %c0_i32, %c0_i32_0 : i32, i32, i32
  }
  func.func @transform_8(%arg0: i32, %arg1: i32) -> (i32, i32, i32) {
    %c0_i32 = arith.constant 0 : i32
    %c0_i32_0 = arith.constant 0 : i32
    %c0_i32_1 = arith.constant 0 : i32
    return %arg1, %c0_i32, %c0_i32_0 : i32, i32, i32
  }
  func.func @transform_9(%arg0: i32, %arg1: i32) -> (i32, i32, i32) {
    %c0_i32 = arith.constant 0 : i32
    %c0_i32_0 = arith.constant 0 : i32
    %c0_i32_1 = arith.constant 0 : i32
    return %arg1, %c0_i32, %c0_i32_0 : i32, i32, i32
  }
  func.func @transform_10(%arg0: i32, %arg1: i32) -> (i32, i32, i32) {
    %c0_i32 = arith.constant 0 : i32
    %c0_i32_0 = arith.constant 0 : i32
    %c0_i32_1 = arith.constant 0 : i32
    return %arg1, %c0_i32, %c0_i32_0 : i32, i32, i32
  }
  func.func @transform_11(%arg0: i32, %arg1: i32) -> (i32, i32, i32) {
    %c0_i32 = arith.constant 0 : i32
    %c0_i32_0 = arith.constant 0 : i32
    %c0_i32_1 = arith.constant 0 : i32
    return %arg1, %c0_i32, %c0_i32_0 : i32, i32, i32
  }
  func.func @transform_12(%arg0: i32, %arg1: i32) -> (i32, i32, i32) {
    %c0_i32 = arith.constant 0 : i32
    %c0_i32_0 = arith.constant 0 : i32
    %c0_i32_1 = arith.constant 0 : i32
    return %arg1, %c0_i32, %c0_i32_0 : i32, i32, i32
  }
  func.func @transform_13(%arg0: i32, %arg1: i32) -> (i32, i32, i32) {
    %c0_i32 = arith.constant 0 : i32
    %c0_i32_0 = arith.constant 0 : i32
    %c0_i32_1 = arith.constant 0 : i32
    return %arg1, %c0_i32, %c0_i32_0 : i32, i32, i32
  }
  func.func @transform_14(%arg0: i32, %arg1: i32) -> (i32, i32, i32) {
    %c0_i32 = arith.constant 0 : i32
    %c0_i32_0 = arith.constant 0 : i32
    %c0_i32_1 = arith.constant 0 : i32
    return %arg0, %c0_i32, %c0_i32_0 : i32, i32, i32
  }
}

</mosaic_0001>

<bundles_post_ra>
// kernel: tpu_custom_call.1
= control target key start
LH: loop header
LB: loop body
LE: loop exit
PB: predicated region body
PF: predicated region fallthrough
CT: control target
= control target key end

     0   :  { %s3028_s0 = inlined_call_operand.hbm [shape: f32[2,8,32], index: 0, kind: input, shape index: {}]   ;;  %s3029_s1 = inlined_call_operand.hbm [shape: bf16[2,8,8], index: 1, kind: input, shape index: {}]   ;;  %s3030_s2 = inlined_call_operand.vmem [shape: bf16[2,32,32], index: 2, kind: input, shape index: {}]   ;;  %s3031_s3 = inlined_call_operand.vmem [shape: bf16[2,32,32], index: 3, kind: input, shape index: {}]   ;;  %s3032_s4 = inlined_call_operand.vmem [shape: bf16[2,32,32], index: 4, kind: input, shape index: {}]   ;;  %s3033_s5 = inlined_call_operand.hbm [shape: bf16[2,32,32], index: 5, kind: input, shape index: {}]   ;;  %s3034_s6 = inlined_call_operand.vmem [shape: f32[2,1,32], index: 6, kind: input, shape index: {}]   ;;  %s3035_s7 = inlined_call_operand.vmem [shape: f32[2,1,32], index: 7, kind: input, shape index: {}]   ;;  %s3036_s8 = inlined_call_operand.hbm [shape: bf16[2,32,64], index: 8, kind: input, shape index: {}]   ;;  %s3037_s9 = inlined_call_operand.hbm [shape: f32[2,1,64], index: 9, kind: input, shape index: {}]   ;;  %s3038_s10 = inlined_call_operand.vmem [shape: bf16[2,64,32], index: 10, kind: input, shape index: {}]   ;;  %s3039_s11 = inlined_call_operand.vmem [shape: f32[2,1,32], index: 11, kind: input, shape index: {}]   ;;  %s3040_s12 = inlined_call_operand.vmem [shape: f32[2,1,32], index: 12, kind: input, shape index: {}]   ;;  %s3041_s13 = inlined_call_operand.vmem [shape: f32[2,1,32], index: 13, kind: input, shape index: {}]   ;;  %s3042_s14 = inlined_call_operand.hbm [shape: f32[2,8,32], index: 14, kind: output, shape index: {}]  }
   0x1   :  { %3074 = sst [smem:[#allocation36_spill]] %s3028_s0 }
   0x2   :  { %3075 = sst [smem:[#allocation37_spill]] %s3029_s1 }
   0x3   :  { %3076 = sst [smem:[#allocation38_spill]] %s3030_s2 }
   0x4   :  { %3077 = sst [smem:[#allocation39_spill]] %s3031_s3 }
   0x5   :  { %3078 = sst [smem:[#allocation40_spill]] %s3032_s4 }
   0x6   :  { %3079 = sst [smem:[#allocation41_spill]] %s3033_s5 }
   0x7   :  { %3080 = sst [smem:[#allocation42_spill]] %s3034_s6 }
   0x8   :  { %3081 = sst [smem:[#allocation43_spill]] %s3035_s7 }
   0x9   :  { %3082 = sst [smem:[#allocation44_spill]] %s3036_s8 }
   0xa   :  { %3083 = sst [smem:[#allocation45_spill]] %s3037_s9 }
   0xb   :  { %3084 = sst [smem:[#allocation46_spill]] %s3038_s10 }
   0xc   :  { %3085 = sst [smem:[#allocation47_spill]] %s3039_s11 }
   0xd   :  { %3086 = sst [smem:[#allocation48_spill]] %s3040_s12 }
   0xe   :  { %3087 = sst [smem:[#allocation49_spill]] %s3041_s13 }
   0xf   :  { %3088 = sst [smem:[#allocation50_spill]] %s3042_s14 }
  0x10   :  { %19 = vsyncpa [#allocation4], 0 }
  0x11   :  { %21 = vsyncpa [#allocation4 + $0x1], 0 }
  0x12   :  { %22 = vsyncpa [#allocation7], 0 }
  0x13   :  { %24 = vsyncpa [#allocation7 + $0x1], 0 }
  0x14   :  { %25 = vsyncpa [#allocation10], 0 }
  0x15   :  { %27 = vsyncpa [#allocation10 + $0x1], 0 }
  0x16   :  { %28 = vsyncpa [#allocation5], 0 }
  0x17   :  { %30 = vsyncpa [#allocation5 + $0x1], 0  ;;  %s2455_s29 = smov 0   ;;  %s2457_s30 = smov 0  }
  0x18   :  { %s2459_s15 = smov 0   ;;  %s2461_s16 = smov 0  }
  0x19   :  { %s2463_s17 = smov 0   ;;  %s2465_s18 = smov 0  }
  0x1a   :  { %s2467_s19 = smov 0   ;;  %s2469_s20 = smov 0  }
  0x1b   :  { %s2471_s21 = smov 0   ;;  %s2473_s22 = smov 0  }
  0x1c   :  { %s2475_s23 = smov 0  }
  0x1d LB: > { %3089 = sst [smem:[#allocation18_spill]] %s2330_s30  ;;  %s2509_s24 = sadd.s32 4294967295, %s2366_s23   ;;  %s2366_s23 = sphi %s2475_s23, %s36_s23   ;;  %s2362_s22 = sphi %s2473_s22, %s3180_s22   ;;  %s2358_s21 = sphi %s2471_s21, %s3179_s21   ;;  %s2354_s20 = sphi %s2469_s20, %s3178_s20   ;;  %s2350_s19 = sphi %s2467_s19, %s3177_s19   ;;  %s2346_s18 = sphi %s2465_s18, %s3176_s18   ;;  %s2342_s17 = sphi %s2463_s17, %s3175_s17   ;;  %s2338_s16 = sphi %s2461_s16, %s3174_s16   ;;  %s2334_s15 = sphi %s2459_s15, %s3173_s15   ;;  %s2330_s30 = sphi %s2457_s30, %s3172_s30   ;;  %s2326_s29 = sphi %s2455_s29, %s3171_s29  }
  0x1e   : > { %3090 = sst [smem:[#allocation19_spill]] %s2334_s15  ;;  %s1754_s25 = sadd.s32 4294967294, %s2366_s23  }
  0x1f   : > { %3091 = sst [smem:[#allocation20_spill]] %s2338_s16  ;;  %p62_p0 = scmp.ne.s32.totalorder %s2346_s18, %s2342_s17 }
  0x20   : > { %3092 = sst [smem:[#allocation21_spill]] %s2342_s17  ;;  %p63_p1 = scmp.eq.s32.totalorder %s2366_s23, 0 }
  0x21   : > { %3093 = sst [smem:[#allocation22_spill]] %s2346_s18  ;;  %p68_p2 = scmp.ne.s32.totalorder %s2342_s17, %s2338_s16 }
  0x22   : > { %3094 = sst [smem:[#allocation23_spill]] %s2350_s19  ;;  %p69_p3 = scmp.eq.s32.totalorder %s2509_s24, 0 }
  0x23   : > { %3095 = sst [smem:[#allocation24_spill]] %s2354_s20  ;;  %p2523_p4 = por %p63_p1, %p62_p0 }
  0x24   : > { %3096 = sst [smem:[#allocation25_spill]] %s2358_s21  ;;  %p2528_p5 = por %p69_p3, %p68_p2 }
  0x25   : > { %3097 = sst [smem:[#allocation26_spill]] %s2362_s22  ;;  %p192_p6 = scmp.ne.s32.totalorder %s2334_s15, %s2330_s30 }
  0x26   : > { %3098 = sst [smem:[#allocation27_spill]] %s2366_s23  ;;  %p198_p7 = scmp.ne.s32.totalorder %s2330_s30, %s2326_s29 }
  0x27   : > { %3099 = sst [smem:[#allocation28_spill]] %s2509_s24  ;;  %p430_p8 = scmp.eq.s32.totalorder %s2509_s24, 3 }
  0x28   : > { %s3101_s20 = scalar_select %p2528_p5, 1, 0 }
  0x29   : > { %p2536_p9 = por %p192_p6, %p63_p1  ;;  %p436_p10 = scmp.eq.s32.totalorder %s1754_s25, 3 }
  0x2a   : > { %p2540_p11 = por %p198_p7, %p69_p3  ;;  %p2547_p12 = por %p430_p8, %p62_p0 }
  0x2b   : > { %p2551_p13 = por %p436_p10, %p68_p2  ;;  %p1960_p1 = scmp.lt.s32.totalorder %s2366_s23, 4 }
  0x2c   : > { %s3103_s26 = scalar_select %p2540_p11, 1, 0 }
  0x2d   : > { %s3105_s14 = scalar_select %p2547_p12, 1, 0 }
  0x2e   : > { %3104 = sst [smem:[#allocation29_spill]] %s3103_s26  ;;  %s2557_s29 = sand.u32 1, %s2346_s18  }
  0x2f   : > { %3106 = sst [smem:[#allocation30_spill]] %s3105_s14  ;;  %s1759_s12 = sshll.u32 %s2557_s29, 2 }
  0x30   : > { %s3107_s16 = scalar_select %p2551_p13, 1, 0 }
  0x31   : > { %p2563_p3 = pnand %p1960_p1, %p2523_p4  ;;  %s1760_s10 = sshll.u32 %s2362_s22, 6 }
  0x32   : > { %3108 = sst [smem:[#allocation31_spill]] %s3107_s16  ;;  %s3110_s1 = sld [smem:[#allocation37_spill]] }
  0x33   : > { %s3109_s25 = scalar_select %p2563_p3, 1, 0 }
  0x34   : > { %s478_s16 = scalar_lea.vmem [#allocation6], %s1759_s12  ;;  %p2575_p0 = pnand %p1960_p1, %p2536_p9 }
  0x35   : > { %s485_s13 = sshll.u32 %s478_s16, 4  ;;  %s3112_s4 = sand.u32 1, %s2366_s23   ;;  %s2579_s13 = int_to_ptr.vmem [resolvable:$true] %s485_s13 }
  0x36   : > { %s3111_s28 = scalar_select %p2575_p0, 1, 0 }
  0x37   : > { %s2583_s3 = scalar_lea.sflag [#allocation7], %s3112_s4  ;;  %p3059_p4 = pneg %p2563_p3 }
  0x38   : > { %s2571_s7 = scalar_lea.hbm %s3110_s1, %s1760_s10  ;;  %s2087_s12 = scalar_lea.hbm %s3110_s1, 128 }
  0x39   : > { %s2082_s2 = scalar_lea.hbm %s2571_s7, 64  ;;  %p2088_p8 = scmp.lt.u32.totalorder %s2571_s7, %s3110_s1 }
  0x3a   : > { %p2083_p2 = scmp.ne.s32.totalorder %s2571_s7, %s2082_s2  ;;  %p2089_p9 = scmp.lt.u32.totalorder %s2087_s12, %s2082_s2 }
  0x3b   : > { %p2091_p1 = scmp.lt.u32.totalorder %s2082_s2, %s2571_s7 }
  0x3c   : > { %p2085_p6 = pnand %p3059_p4, %p2083_p2  ;;  %p2090_p10 = por %p2089_p9, %p2088_p8 }
  0x3e   : > { %p2086_p7 = pneg %p2085_p6  ;;  %p2092_p13 = por %p2091_p1, %p2090_p10 }
  0x40   : > { %p2093_p12 = pnand %p2092_p13, %p2086_p7 }
  0x42   : > { %2096 = shalt.err (!%p2093_p12)
}
  0x43   : > { %s2097_s4 = scalar_lea.vmem %s2579_s13, 64  ;;  %s2368_s27 = smov [#allocation6]  }
  0x44   : > { %p2098_p2 = scmp.ne.s32.totalorder %s2579_s13, %s2097_s4  ;;  %s2102_s10 = sshll.u32 %s2368_s27, 4  ;;  %s2103_s10 = int_to_ptr.vmem [resolvable:$false] %s2102_s10 }
  0x45   : > { %s2104_s11 = scalar_lea.vmem %s2103_s10, 128  ;;  %p2105_p5 = scmp.lt.s32.totalorder %s2579_s13, %s2103_s10 }
  0x46   : > { %p2100_p6 = pnand %p2098_p2, %p3059_p4  ;;  %p2106_p8 = scmp.lt.s32.totalorder %s2104_s11, %s2097_s4 }
  0x48   : > { %p2101_p11 = pneg %p2100_p6  ;;  %p2107_p9 = por %p2106_p8, %p2105_p5 }
  0x4a   : > { %p2108_p10 = pnand %p2107_p9, %p2101_p11 }
  0x4c   : > { %2111 = shalt.err (!%p2108_p10)
}
  0x4d   : > { %1946 = dma.hbm_to_vmem [thread:$0]  (!%p2563_p3), %s2571_s7, 64, %s2579_s13, %s2583_s3  }
  0x4e   : > { %p1768_p12 = scmp.ge.s32.totalorder %s2366_s23, 1  ;;  %p611_p13 = scmp.lt.s32.totalorder %s2366_s23, 5 }
  0x4f   : > { %s3051_s2 = sand.u32 1, %s2334_s15   ;;  %s45_s14 = sadd.s32 1, %s2358_s21 }
  0x50   : > { %p2614_p5 = pnand %p1768_p12, %p611_p13  ;;  %p46_p11 = scmp.ge.s32.totalorder %s45_s14, 2 }
  0x51   : > { %s1761_s16 = sshll.u32 %s3051_s2, 4  ;;  %s1818_s4 = sshll.u32 %s2358_s21, 8 }
  0x52   : > { %s3113_s12 = scalar_select %p2614_p5, 1, 0 }
  0x53   : > { %s3182_s14 = smov (%p46_p11, %s45_s14), 0  ;;  %s3115_s7 = sadd.s32 1, %s2362_s22 }
  0x54   : > { %3114 = sst [smem:[#allocation32_spill]] %s3182_s14  ;;  %s3184_s7 = smov (!%p46_p11, %s3115_s7), %s2362_s22 }
  0x55   : > { %s182_s13 = ssub.s32 %s2358_s21, %s3182_s14  ;;  %s3116_s5 = sld [smem:[#allocation41_spill]] }
  0x56   : > { %p50_p7 = scmp.ge.s32.totalorder %s3184_s7, 2  ;;  %p183_p1 = scmp.eq.s32.totalorder %s182_s13, 0 }
  0x57   : > { %s520_s1 = scalar_lea.vmem [#allocation8], %s1761_s16  ;;  %s3118_s6 = sadd.s32 1, %s2334_s15 }
  0x58   : > { %s527_s2 = sshll.u32 %s520_s1, 4  ;;  %s3186_s7 = smov (%p50_p7, %s3184_s7), 0  ;;  %s2643_s2 = int_to_ptr.vmem [resolvable:$true] %s527_s2 }
  0x59   : > { %3117 = sst [smem:[#allocation33_spill]] %s3186_s7  ;;  %s52_s26 = ssub.s32 %s2362_s22, %s3186_s7 }
  0x5a   : > { %s2639_s19 = scalar_select %p183_p1, %s2334_s15, %s3118_s6  }
  0x5b   : > { %s2632_s11 = scalar_lea.hbm %s3116_s5, %s1818_s4  ;;  %p53_p2 = scmp.eq.s32.totalorder %s52_s26, 0 }
  0x5c   : > { %3119 = sst [smem:[#allocation34_spill]] %s2639_s19  ;;  %s3120_s8 = sld [smem:[#allocation44_spill]] }
  0x5d   : > { %s3121_s30 = sadd.s32 1, %s2346_s18  ;;  %s553_s13 = scalar_lea.vmem [#allocation9], %s1761_s16 }
  0x5e   : > { %s2653_s1 = scalar_select %p53_p2, %s2346_s18, %s3121_s30  }
  0x5f   : > { %s560_s24 = sshll.u32 %s553_s13, 4  ;;  %s3123_s6 = sand.u32 1, %s2366_s23   ;;  %s2655_s24 = int_to_ptr.vmem [resolvable:$true] %s560_s24 }
  0x60   : > { %3122 = sst [smem:[#allocation35_spill]] %s2653_s1  ;;  %s2659_s7 = scalar_lea.sflag [#allocation10], %s3123_s6 }
  0x61   : > { %p2665_p8 = pneg %p2575_p0 }
  0x62   : > { %s2648_s10 = scalar_lea.hbm %s3120_s8, %s1818_s4  ;;  %s2117_s16 = scalar_lea.hbm %s3120_s8, 512 }
  0x63   : > { %s2112_s26 = scalar_lea.hbm %s2648_s10, 256  ;;  %p2118_p12 = scmp.lt.u32.totalorder %s2648_s10, %s3120_s8 }
  0x64   : > { %p2113_p6 = scmp.ne.s32.totalorder %s2648_s10, %s2112_s26  ;;  %p2119_p13 = scmp.lt.u32.totalorder %s2117_s16, %s2112_s26 }
  0x65   : > { %s3124_s14 = scalar_select %p2665_p8, 1, 0 }
  0x66   : > { %p2115_p9 = pnand %p2665_p8, %p2113_p6  ;;  %p2120_p11 = por %p2119_p13, %p2118_p12 }
  0x67   : > { %p2121_p7 = scmp.lt.u32.totalorder %s2112_s26, %s2648_s10 }
  0x68   : > { %p2116_p10 = pneg %p2115_p9 }
  0x69   : > { %p2122_p1 = por %p2121_p7, %p2120_p11 }
  0x6b   : > { %p2123_p2 = pnand %p2122_p1, %p2116_p10 }
  0x6d   : > { %2126 = shalt.err (!%p2123_p2)
}
  0x6e   : > { %s2127_s6 = scalar_lea.vmem %s2655_s24, 256  ;;  %s2369_s30 = smov [#allocation9]  }
  0x6f   : > { %p2128_p6 = scmp.ne.s32.totalorder %s2655_s24, %s2127_s6  ;;  %s2132_s4 = sshll.u32 %s2369_s30, 4  ;;  %s2133_s4 = int_to_ptr.vmem [resolvable:$false] %s2132_s4 }
  0x70   : > { %s2134_s27 = scalar_lea.vmem %s2133_s4, 512  ;;  %p2135_p5 = scmp.lt.s32.totalorder %s2655_s24, %s2133_s4 }
  0x71   : > { %p2130_p9 = pnand %p2128_p6, %p2665_p8  ;;  %p2136_p3 = scmp.lt.s32.totalorder %s2134_s27, %s2127_s6 }
  0x73   : > { %p2131_p4 = pneg %p2130_p9  ;;  %p2137_p12 = por %p2136_p3, %p2135_p5 }
  0x75   : > { %p2138_p13 = pnand %p2137_p12, %p2131_p4 }
  0x77   : > { %2141 = shalt.err (!%p2138_p13)
}
  0x78   : > { %s2370_s26 = smov 64   ;;  %s2371_s16 = smov 4  }
  0x79   : > { %1952 = dma.hbm_to_vmem [thread:$0]  (!%p2575_p0), %s2648_s10, 256, %s2655_s24, %s2659_s7, %s2370_s26, %s2370_s26, %s2371_s16  }
  0x7a   : > { %s1757_s13 = sshll.u32 %s2557_s29, 3  ;;  %s1758_s6 = sshll.u32 %s2362_s22, 7 }
  0x7b   : > { %s3125_s0 = sld [smem:[#allocation36_spill]]  ;;  %s460_s8 = scalar_lea.vmem [#allocation3], %s1757_s13 }
  0x7c   : > { %s467_s1 = sshll.u32 %s460_s8, 4  ;;  %s457_s18 = scalar_lea.sflag [#allocation4], %s2557_s29  ;;  %s468_s1 = int_to_ptr.vmem [resolvable:$true] %s467_s1 }
  0x7d   : > { %p3126_p4 = scmp.ne.s32.totalorder %s3109_s25, 0 }
  0x7f   : > { %p3127_p5 = pneg %p3126_p4 }
  0x81   : > { %s2697_s27 = scalar_lea.hbm %s3125_s0, %s1758_s6  ;;  %s2147_s30 = scalar_lea.hbm %s3125_s0, 256 }
  0x82   : > { %s2142_s19 = scalar_lea.hbm %s2697_s27, 128  ;;  %p2148_p7 = scmp.lt.u32.totalorder %s2697_s27, %s3125_s0 }
  0x83   : > { %p2143_p3 = scmp.ne.s32.totalorder %s2697_s27, %s2142_s19  ;;  %p2149_p1 = scmp.lt.u32.totalorder %s2147_s30, %s2142_s19 }
  0x84   : > { %p2151_p6 = scmp.lt.u32.totalorder %s2142_s19, %s2697_s27 }
  0x85   : > { %p2145_p10 = pnand %p2143_p3, %p3127_p5  ;;  %p2150_p2 = por %p2149_p1, %p2148_p7 }
  0x87   : > { %p2146_p11 = pneg %p2145_p10  ;;  %p2152_p9 = por %p2151_p6, %p2150_p2 }
  0x89   : > { %p2153_p12 = pnand %p2152_p9, %p2146_p11 }
  0x8b   : > { %2156 = shalt.err (!%p2153_p12)
}
  0x8c   : > { %s2157_s8 = scalar_lea.vmem %s468_s1, 128  ;;  %p3128_p3 = pmov %p3127_p5 }
  0x8d   : > { %p2158_p13 = scmp.ne.s32.totalorder %s468_s1, %s2157_s8  ;;  %s2372_s29 = smov [#allocation3]  }
  0x8e   : > { %s2162_s13 = sshll.u32 %s2372_s29, 4  ;;  %s2163_s13 = int_to_ptr.vmem [resolvable:$false] %s2162_s13 }
  0x8f   : > { %p2160_p5 = pnand %p2158_p13, %p3128_p3  ;;  %s2164_s24 = scalar_lea.vmem %s2163_s13, 256 }
  0x90   : > { %p2165_p0 = scmp.lt.s32.totalorder %s468_s1, %s2163_s13  ;;  %p2166_p8 = scmp.lt.s32.totalorder %s2164_s24, %s2157_s8 }
  0x91   : > { %p2161_p10 = pneg %p2160_p5 }
  0x92   : > { %p2167_p1 = por %p2166_p8, %p2165_p0 }
  0x94   : > { %p2168_p7 = pnand %p2167_p1, %p2161_p10 }
  0x96   : > { %2171 = shalt.err (!%p2168_p7)
}
  0x97   : > { %1943 = dma.hbm_to_vmem [thread:$0]  (!%p3126_p4), %s2697_s27, 128, %s468_s1, %s457_s18  }
  0x98   : > { %s2172_s19 = scalar_lea.hbm %s2632_s11, 256  ;;  %p3129_p2 = scmp.ne.s32.totalorder %s3124_s14, 0 }
  0x99   : > { %p2173_p11 = scmp.ne.s32.totalorder %s2632_s11, %s2172_s19  ;;  %s2177_s6 = scalar_lea.hbm %s3116_s5, 512 }
  0x9a   : > { %p2178_p0 = scmp.lt.u32.totalorder %s2632_s11, %s3116_s5  ;;  %p2179_p8 = scmp.lt.u32.totalorder %s2177_s6, %s2172_s19 }
  0x9b   : > { %p2175_p6 = pnand %p2173_p11, %p3129_p2  ;;  %p2181_p13 = scmp.lt.u32.totalorder %s2172_s19, %s2632_s11 }
  0x9c   : > { %p2180_p12 = por %p2179_p8, %p2178_p0 }
  0x9d   : > { %p2176_p9 = pneg %p2175_p6 }
  0x9e   : > { %p2182_p3 = por %p2181_p13, %p2180_p12 }
  0xa0   : > { %p2183_p5 = pnand %p2182_p3, %p2176_p9 }
  0xa2   : > { %2186 = shalt.err (!%p2183_p5)
}
  0xa3   : > { %s2187_s18 = scalar_lea.vmem %s2643_s2, 256  ;;  %s2373_s25 = smov [#allocation8]  }
  0xa4   : > { %p2188_p4 = scmp.ne.s32.totalorder %s2643_s2, %s2187_s18  ;;  %s2192_s1 = sshll.u32 %s2373_s25, 4  ;;  %s2193_s1 = int_to_ptr.vmem [resolvable:$false] %s2192_s1 }
  0xa5   : > { %s2194_s27 = scalar_lea.vmem %s2193_s1, 512  ;;  %p2195_p7 = scmp.lt.s32.totalorder %s2643_s2, %s2193_s1 }
  0xa6   : > { %p2190_p10 = pnand %p2188_p4, %p3129_p2  ;;  %p2196_p11 = scmp.lt.s32.totalorder %s2194_s27, %s2187_s18 }
  0xa8   : > { %p2191_p1 = pneg %p2190_p10  ;;  %p2197_p6 = por %p2196_p11, %p2195_p7 }
  0xaa   : > { %p2198_p0 = pnand %p2197_p6, %p2191_p1 }
  0xac   : > { %2201 = shalt.err (!%p2198_p0)
}
  0xad   : > { %p3130_p9 = scmp.ne.s32.totalorder %s3111_s28, 0  ;;  %s1767_s29 = sshll.u32 %s2358_s21, 4 }
  0xae   : > { %s3131_s13 = sand.u32 1, %s2334_s15   ;;  %s3132_s9 = sld [smem:[#allocation45_spill]] }
  0xaf   : > { %1949 = dma.hbm_to_vmem [thread:$0]  (!%p3130_p9), %s2632_s11, 256, %s2643_s2, %s2583_s3, %s2370_s26, %s2370_s26, %s2371_s16  }
  0xb0   : > { %s573_s24 = scalar_lea.vmem [#allocation11], %s3131_s13 }
  0xb1   : > { %s580_s19 = sshll.u32 %s573_s24, 4  ;;  %s581_s19 = int_to_ptr.vmem [resolvable:$true] %s580_s19 }
  0xb4   : > { %s578_s6 = scalar_lea.hbm %s3132_s9, %s1767_s29  ;;  %s2207_s25 = scalar_lea.hbm %s3132_s9, 32 }
  0xb5   : > { %s2202_s4 = scalar_lea.hbm %s578_s6, 16  ;;  %p2208_p3 = scmp.lt.u32.totalorder %s578_s6, %s3132_s9 }
  0xb6   : > { %p2203_p8 = scmp.ne.s32.totalorder %s578_s6, %s2202_s4  ;;  %p2209_p5 = scmp.lt.u32.totalorder %s2207_s25, %s2202_s4 }
  0xb7   : > { %p2211_p10 = scmp.lt.u32.totalorder %s2202_s4, %s578_s6 }
  0xb8   : > { %p2205_p12 = pnand %p2203_p8, %p3129_p2  ;;  %p2210_p4 = por %p2209_p5, %p2208_p3 }
  0xba   : > { %p2206_p13 = pneg %p2205_p12  ;;  %p2212_p1 = por %p2211_p10, %p2210_p4 }
  0xbc   : > { %p2213_p7 = pnand %p2212_p1, %p2206_p13 }
  0xbe   : > { %2216 = shalt.err (!%p2213_p7)
}
  0xbf   : > { %s2217_s2 = scalar_lea.vmem %s581_s19, 16  ;;  %s2374_s11 = smov [#allocation11]  }
  0xc0   : > { %p2218_p11 = scmp.ne.s32.totalorder %s581_s19, %s2217_s2  ;;  %s2222_s26 = sshll.u32 %s2374_s11, 4  ;;  %s2223_s26 = int_to_ptr.vmem [resolvable:$false] %s2222_s26 }
  0xc1   : > { %s2224_s16 = scalar_lea.vmem %s2223_s26, 32  ;;  %p2225_p8 = scmp.lt.s32.totalorder %s581_s19, %s2223_s26 }
  0xc2   : > { %p2220_p6 = pnand %p2218_p11, %p3129_p2  ;;  %p2226_p12 = scmp.lt.s32.totalorder %s2224_s16, %s2217_s2 }
  0xc4   : > { %p2221_p0 = pneg %p2220_p6  ;;  %p2227_p9 = por %p2226_p12, %p2225_p8 }
  0xc6   : > { %p2228_p3 = pnand %p2227_p9, %p2221_p0 }
  0xc8   : > { %2231 = shalt.err (!%p2228_p3)
}
  0xc9   : > { %p3133_p5 = scmp.ne.s32.totalorder %s3111_s28, 0  ;;  %p3134_p13 = scmp.ne.s32.totalorder %s3113_s12, 0 }
  0xca   : > { %s2766_s14 = sand.u32 (!%p3134_p13), 1, %s2342_s17   ;;  %p3135_p2 = scmp.ne.s32.totalorder (!%p3134_p13), %s3101_s20, 0 }
  0xcb   : > { %1955 = dma.hbm_to_vmem [thread:$0]  (!%p3133_p5), %s578_s6, 16, %s581_s19, %s2659_s7  }
  0xcc   : > { %615 = sbr.rel (%p3134_p13) target bundleno = 2772 (0xad4), region = 76  ;;  %s3067_s27 = sshll.u32 (!%p3134_p13), %s2766_s14, 3 }
  0xcd   : > { %s618_s29 = scalar_lea.sflag (!%p3134_p13), [#allocation4], %s2766_s14  ;;  %s2772_s13 = scalar_lea.vmem (!%p3134_p13), [#allocation3], %s3067_s27 }
  0xd3   : > { %2305 = dma.done.wait (%p3135_p2), %s618_s29, 128  }
  0xd4   : > { %2307 = vsyncadd (%p3135_p2), %s618_s29, 4294967168  ;;  %s3136_s28 = sld [smem:[#allocation28_spill]]  ;;  %s1770_s7 = sshll.u32 %s2766_s14, 2 }
  0xd5   : > { %s2780_s19 = scalar_lea.vmem [#allocation6], %s1770_s7 }
  0xda   : > { %s626_s12 = sand.u32 1, %s3136_s28  }
  0xdb   : > { %s627_s24 = scalar_lea.sflag [#allocation7], %s626_s12 }
  0xdc   : > { %2309 = dma.done.wait (%p3135_p2), %s627_s24, 64  }
  0xdd   : > { %2311 = vsyncadd (%p3135_p2), %s627_s24, 4294967232  ;;  %s3137_s10 = sld [smem:[#allocation18_spill]]  ;;  %s3138_s30 = sld [smem:[#allocation29_spill]] }
  0xe3   : > { %s637_s6 = sand.u32 1, %s3137_s10   ;;  %p3139_p9 = scmp.ne.s32.totalorder %s3138_s30, 0 }
  0xe4   : > { %s2787_s4 = sshll.u32 %s637_s6, 4 }
  0xe5   : > { %2313 = dma.done.wait (%p3139_p9), %s627_s24, 256  }
  0xe6   : > { %2315 = vsyncadd (%p3139_p9), %s627_s24, 4294967040  ;;  %s645_s18 = scalar_lea.sflag [#allocation10], %s626_s12 }
  0xe7   : > { %2317 = dma.done.wait (%p3139_p9), %s645_s18, 272  }
  0xe8   : > { %2319 = vsyncadd (%p3139_p9), %s645_s18, 4294967024  ;;  %s3140_s20 = sld [smem:[#allocation23_spill]]  ;;  %s3143_s30 = sld [smem:[#allocation39_spill]] }
  0xe9   : > { %s3142_s12 = sld [smem:[#allocation38_spill]]  ;;  %s3144_s27 = sld [smem:[#allocation40_spill]] }
  0xea   : > { %s3145_s22 = sld [smem:[#allocation43_spill]]  ;;  %s3146_s16 = sld [smem:[#allocation47_spill]] }
  0xeb   : > { %s3147_s17 = sld [smem:[#allocation46_spill]]  ;;  %s2843_s5 = scalar_lea.vmem [#allocation11], %s637_s6 }
  0xec   : > { %s3150_s9 = sshll.u32 %s2766_s14, 3 }
  0xee   : > { %p755_p4 = scmp.lt.s32.totalorder %s3140_s20, 1  ;;  %p1782_p10 = scmp.ne.s32.totalorder %s3140_s20, 0 }
  0xef   : > { %v795_v0 = vld [vmem:[%s2772_s13] sm:$0xff] (!%p1782_p10)  ;;  %vm796_vm0 = vcmask (!%p1782_p10), 261120  }
  0xf0   : > { %s2801_s1 = scalar_select %p755_p4, %s3140_s20, 1 }
  0xf1   : > { %797 = vst.msk [vmem:[#allocation2] sm:$0xff] (!%p1782_p10), %vm796_vm0, %v795_v0 }
  0xf2   : > { %s1820_s3 = sshll.u32 %s2801_s1, 4  ;;  %s775_s21 = scalar_lea.vmem %s3145_s22, %s2801_s1 }
  0xf3   : > { %s2811_s7 = scalar_lea.vmem %s3142_s12, %s1820_s3  ;;  %s764_s18 = scalar_lea.vmem %s3143_s30, %s1820_s3 }
  0xf4   : > { %s2819_s0 = scalar_lea.vmem %s3144_s27, %s1820_s3  ;;  %s1823_s2 = sshll.u32 %s2801_s1, 5 }
  0xf5   : > { %s783_s29 = scalar_lea.vmem %s3146_s16, %s2801_s1  ;;  %s2833_s15 = scalar_lea.vmem %s3147_s17, %s1823_s2 }
  0xf6   : > { %s3148_s30 = sld [smem:[#allocation48_spill]]  ;;  %s3149_s3 = sld [smem:[#allocation49_spill]] }
  0xf7   : > { %s2847_s22 = scalar_lea.vmem [#allocation12], %s3150_s9  ;;  %794 = sbr.rel (%p1782_p10) target bundleno = 254 (0xfe), region = 100 }
  0xfc   : > { %s786_s8 = scalar_lea.vmem %s3148_s30, %s2801_s1  ;;  %s789_s23 = scalar_lea.vmem %s3149_s3, %s2801_s1 }
  0xfe PF: > { %v2056_v1 = vld [vmem:[%s764_s18] sm:$0xff]   ;;  %v2375_v2 = vmov 0.0   ;;  %v2058_v4 = vld [vmem:[%s764_s18 + $0x8] sm:$0xff]   ;;  %vm2376_vm1 = vmmov 0   ;;  %vm818_vm2 = vcmask 261120   ;;  %vm978_vm3 = vcmask 130048  }
  0xff   : > { %1860 = vmatprep.subr.bf16.mxu1 %v2375_v2  ;;  %1852 = vmatprep.subr.bf16.mxu0 %v2375_v2  ;;  %v2057_v3 = vld [vmem:[%s2811_s7] sm:$0xff]   ;;  %v2059_v6 = vld [vmem:[%s2811_s7 + $0x8] sm:$0xff]   ;;  %s2377_s17 = smov 112   ;;  %v800_v25 = vld [vmem:[%s2780_s19] sm:$0xf]  ;;  %vm1025_vm4 = vcmask 64512  }
 0x100   : > { %1861 = vmatpush3.bf16.msra.mxu1 %v2056_v1  ;;  %1864 = vmatprep.mubr.msk.bf16.mxu1 %vm2376_vm1, %v2375_v2  ;;  %v2857_v5 = vld [vmem:[#allocation2] sm:$0xff]  ;;  %v2061_v21 = vld [vmem:[%s2819_s0 + $0x8] sm:$0xff]   ;;  %v801_v26 = vunpack.c.l.bf16 %v800_v25  ;;  %vm1041_vm5 = vcmask 1043456   ;;  %s2378_s19 = smov 16   ;;  %s3153_s6 = scalar_lea.vmem [#allocation9], %s2787_s4  ;;  %vm1401_vm6 = vcmask 523264  }
 0x101   : > { %1862 = vmatprep.subr.bf16.mxu1 %v2375_v2  ;;  %1853 = vmatpush3.bf16.msra.mxu0 %v2057_v3  ;;  %v799_v7 = vpack.c.bf16 %v2857_v5, %v2857_v5  ;;  %v2060_v20 = vld [vmem:[%s2819_s0] sm:$0xff]   ;;  %s3151_s0 = scalar_lea.vmem [#allocation8], %s2787_s4  ;;  %s3154_s20 = smov %s3153_s6 }
 0x102   : > { %1854 = vmatprep.subr.bf16.mxu0 %v2375_v2  ;;  %1856 = vmatprep.mubr.msk.bf16.mxu0 %vm2376_vm1, %v2375_v2  ;;  %v2062_v1 = vld [vmem:[%s3151_s0] sm:$0xff]   ;;  %s3152_s13 = smov %s3151_s0  ;;  %s3155_s7 = sld [smem:[#allocation42_spill]] }
 0x103   : > { %s3161_s25 = sld [smem:[#allocation23_spill]] }
 0x104   : > { %1863 = vmatpush3.bf16.msra.mxu1 %v2058_v4 }
 0x105   : > { %1855 = vmatpush3.bf16.msra.mxu0 %v2059_v6  ;;  %1876 = vmatprep.subr.bf16.mxu1 %v2375_v2 }
 0x106   : > { %1868 = vmatprep.subr.bf16.mxu0 %v2375_v2 }
 0x107   : > { %1865 = vmatmul.mubr.msk.bf16.vlgmr.msra.gmra.mrb[0].mxu1 %vm818_vm2, %v799_v7 }
 0x108   : > { %1857 = vmatmul.mubr.msk.bf16.vlgmr.msra.gmra.mrb[0].mxu0 %vm818_vm2, %v799_v7  ;;  %1878 = vmatprep.mubr.msk.bf16.mxu1 %vm2376_vm1, %v2375_v2  ;;  %s3156_s18 = scalar_lea.vmem %s3155_s7, %s2801_s1 }
 0x109   : > { %1872 = vmatprep.mubr.msk.bf16.mxu0 %vm2376_vm1, %v2375_v2  ;;  %1869 = vmatpush3.bf16.msra.mxu0 %v2060_v20  ;;  %p1813_p1 = scmp.ne.s32.totalorder %s3161_s25, 1 }
 0x10a   : > { %1870 = vmatprep.subr.bf16.mxu0 %v2375_v2 }
 0x10d   : > { %1871 = vmatpush3.bf16.msra.mxu0 %v2061_v21 }
 0x10e   : > { %1882 = vmatprep.subr.bf16.mxu0 %v2375_v2 }
 0x110   : > { %1873 = vmatmul.mubr.msk.bf16.vlgmr.msra.gmra.mrb[4].mxu0 %vm818_vm2, %v799_v7 }
 0x111   : > { %1884 = vmatprep.mubr.msk.bf16.mxu0 %vm2376_vm1, %v2375_v2 }
 0x1da   : > { %v912_v8 = vpop.f32.mrb[0].mxu1 }
 0x1db   : > { %v976_v9 = vpack.c.bf16 %v912_v8, %v912_v8  ;;  %v1866_v10 = vpop.f32.mrb[1].mxu1  ;;  %v856_v11 = vpop.f32.mrb[0].mxu0  ;;  %v2063_v8 = vld [vmem:[%s3152_s13 + $0x8] sm:$0xff]  }
 0x1dc   : > { %v915_v12 = vpop.f32.mrb[2].mxu1  ;;  %v974_v13 = vmul.f32 0.25, %v856_v11  ;;  %v1858_v14 = vpop.f32.mrb[1].mxu0 }
 0x1dd   : > { %v983_v15 = vsel %vm978_vm3, %v976_v9, 0  ;;  %1089 = vrot.lane.b32.xlu0 %v976_v9, %s2377_s17  ;;  %v1867_v16 = vpop.f32.mrb[3].mxu1  ;;  %v859_v17 = vpop.f32.mrb[2].mxu0 }
 0x1de   : > { %v975_v18 = vpack.c.bf16 %v974_v13, %v974_v13  ;;  %1877 = vmatpush3.bf16.xpose.msra.mxu1 %v983_v15  ;;  %v1859_v19 = vpop.f32.mrb[3].mxu0 }
 0x1df   : > { %1888 = vmatprep.subr.bf16.mxu1 %v2375_v2 }
 0x1e1   : > { %1086 = vrot.lane.b32.xlu0 %v975_v18, %s2377_s17 }
 0x1e3   : > { %v968_v44 = vpop.f32.mrb[4].mxu0 }
 0x1e4   : > { %v1874_v45 = vpop.f32.mrb[5].mxu0  ;;  %v977_v48 = vpack.c.bf16 %v968_v44, %v968_v44 }
 0x1e5   : > { %1879 = vmatmul.mubr.msk.bf16.vlgmr.msra.gmra.mrb[4].mxu1 %vm978_vm3, %v975_v18  ;;  %v971_v46 = vpop.f32.mrb[6].mxu0 }
 0x1e6   : > { %1890 = vmatprep.mubr.msk.bf16.mxu1 %vm2376_vm1, %v2375_v2  ;;  %v1875_v47 = vpop.f32.mrb[7].mxu0  ;;  %v1043_v49 = vsel %vm1041_vm5, %v977_v48, 0 }
 0x1e7   : > { %1883 = vmatpush3.bf16.msra.mxu0 %v1043_v49 }
 0x1e8   : > { %1894 = vmatprep.subr.bf16.mxu0 %v2375_v2 }
 0x24f   : > { %v1090_v22 = vpop.permute.xlu0 %1089 }
 0x250   : > { %v1095_v23 = vsel %vm978_vm3, %v1090_v22, 0 }
 0x251   : > { %1889 = vmatpush3.bf16.xpose.msra.mxu1 %v1095_v23 }
 0x252   : > { %1900 = vmatprep.subr.bf16.mxu1 %v2375_v2 }
 0x253   : > { %v1087_v24 = vpop.permute.xlu0 %1086 }
 0x258   : > { %1891 = vmatmul.mubr.msk.bf16.vlgmr.msra.gmra.mrb[8].mxu1 %vm978_vm3, %v1087_v24 }
 0x259   : > { %1904 = vmatprep.mubr.msk.bf16.mxu1 %vm2376_vm1, %v2375_v2  ;;  %1901 = vmatpush3.bf16.msra.mxu1 %v2062_v1 }
 0x25a   : > { %1902 = vmatprep.subr.bf16.mxu1 %v2375_v2 }
 0x25d   : > { %1903 = vmatpush3.bf16.msra.mxu1 %v2063_v8 }
 0x25e   : > { %1916 = vmatprep.subr.bf16.mxu1 %v2375_v2 }
 0x2b8   : > { %v1019_v27 = vpop.f32.mrb[4].mxu1 }
 0x2b9   : > { %v1020_v28 = vadd.f32 %v1019_v27, %v801_v26  ;;  %v1880_v29 = vpop.f32.mrb[5].mxu1  ;;  %v2064_v27 = vld [vmem:[%s3153_s6] sm:$0xff]  }
 0x2ba   : > { %v1022_v30 = vpop.f32.mrb[6].mxu1  ;;  %v2067_v29 = vld [vmem:[%s2833_s15 + $0x8] sm:$0xff]  }
 0x2bb   : > { %v1881_v31 = vpop.f32.mrb[7].mxu1  ;;  %v1026_v32 = vsel %vm1025_vm4, %v1020_v28, -inf }
 0x2bc   : > { %1027 = vmax.xlane.f32.xlu1 %v1026_v32 }
 0x32b   : > { %v1131_v33 = vpop.f32.mrb[8].mxu1 }
 0x32c   : > { %v1132_v34 = vadd.f32 %v1131_v33, %v801_v26  ;;  %v1892_v35 = vpop.f32.mrb[9].mxu1 }
 0x32d   : > { %v1134_v36 = vpop.f32.mrb[10].mxu1 }
 0x32e   : > { %v1893_v37 = vpop.f32.mrb[11].mxu1  ;;  %v1137_v38 = vsel %vm1025_vm4, %v1132_v34, -inf  ;;  %v1800_v36 = vld [vmem:[%s775_s21] ss:$0 sm:$0xff] }
 0x32f   : > { %1138 = vmax.xlane.f32.xlu1 %v1137_v38 }
 0x349   : > { %v1028_v39 = vpop.xlane.xlu1 %1027 }
 0x34a   : > { %v1029_v40 = vsub.f32 %v1020_v28, %v1028_v39  ;;  %v2066_v28 = vld [vmem:[%s2833_s15] sm:$0xff]  }
 0x34c   : > { %v1030_v41 = vmul.f32 1.442695, %v1029_v40  ;;  %v2068_v40 = vld [vmem:[%s2833_s15 + $0x10] sm:$0xff]  }
 0x34e   : > { %2070 = vpow2.f32 %v1030_v41  ;;  %v2069_v41 = vld [vmem:[%s2833_s15 + $0x18] sm:$0xff]  }
 0x358   : > { %v2071_v42 = vpop.eup %2070 }
 0x359   : > { %v1032_v43 = vsel %vm1025_vm4, %v2071_v42, 0.0 }
 0x35a   : > { %1033 = vadd.xlane.f32.xlu0 %v1032_v43 }
 0x3bc   : > { %v1139_v50 = vpop.xlane.xlu1 %1138 }
 0x3bd   : > { %v1140_v51 = vsub.f32 %v1132_v34, %v1139_v50  ;;  %v1799_v34 = vld [vmem:[%s3156_s18] ss:$0 sm:$0xff] }
 0x3be   : > { %v1805_v50 = vld [vmem:[%s783_s29] ss:$0 sm:$0xff] }
 0x3bf   : > { %v1141_v52 = vmul.f32 1.442695, %v1140_v51 }
 0x3c1   : > { %2072 = vpow2.f32 %v1141_v52 }
 0x3cb   : > { %v2073_v53 = vpop.eup %2072 }
 0x3cc   : > { %v1143_v54 = vsel %vm1025_vm4, %v2073_v53, 0.0 }
 0x3cd   : > { %1144 = vadd.xlane.f32.xlu1 %v1143_v54 }
 0x3de   : > { %1150 = vrot.lane.b32.xlu1 %v977_v48, %s2377_s17 }
 0x3e7   : > { %v1034_v55 = vpop.xlane.xlu0 %1033 }
 0x3e8   : > { %2074 = vrcp.f32 %v1034_v55 }
 0x3f2   : > { %v2075_v56 = vpop.eup %2074 }
 0x3f3   : > { %v1036_v57 = vmul.f32 %v2075_v56, %v2071_v42  ;;  %v1801_v42 = vld [vmem:[%s2843_s5] ss:$0 sm:$0xff] }
 0x3f5   : > { %v1037_v58 = vpack.c.bf16 %v1036_v57, %v1036_v57 }
 0x3f7   : > { %1885 = vmatmul.mubr.msk.bf16.vlgmr.msra.gmra.mrb[8].mxu0 %vm1025_vm4, %v1037_v58 }
 0x3f8   : > { %1896 = vmatprep.mubr.msk.bf16.mxu0 %vm2376_vm1, %v2375_v2 }
 0x45a   : > { %v1145_v59 = vpop.xlane.xlu1 %1144 }
 0x45b   : > { %2076 = vrcp.f32 %v1145_v59 }
 0x45e   : > { %v1151_v60 = vpop.permute.xlu1 %1150 }
 0x45f   : > { %v1156_v61 = vsel %vm1041_vm5, %v1151_v60, 0 }
 0x460   : > { %1895 = vmatpush3.bf16.msra.mxu0 %v1156_v61 }
 0x461   : > { %1908 = vmatprep.subr.bf16.mxu0 %v2375_v2 }
 0x465   : > { %v2077_v62 = vpop.eup %2076 }
 0x466   : > { %v1147_v63 = vmul.f32 %v2077_v62, %v2073_v53 }
 0x468   : > { %v1148_v0 = vpack.c.bf16 %v1147_v63, %v1147_v63 }
 0x46a   : > { %1897 = vmatmul.mubr.msk.bf16.vlgmr.msra.gmra.mrb[12].mxu0 %vm1025_vm4, %v1148_v0 }
 0x46b   : > { %1912 = vmatprep.mubr.msk.bf16.mxu0 %vm2376_vm1, %v2375_v2  ;;  %1909 = vmatpush3.bf16.msra.mxu0 %v2064_v27 }
 0x46c   : > { %1910 = vmatprep.subr.bf16.mxu0 %v2375_v2 }
 0x4ca   : > { %v1079_v3 = vpop.f32.mrb[8].mxu0 }
 0x4cb   : > { %v1886_v4 = vpop.f32.mrb[9].mxu0 }
 0x4cc   : > { %v1082_v6 = vpop.f32.mrb[10].mxu0 }
 0x4cd   : > { %v1887_v7 = vpop.f32.mrb[11].mxu0  ;;  %v1812_v6 = vld [vmem:[%s789_s23] ss:$0 sm:$0xff] }
 0x53d   : > { %v1192_v9 = vpop.f32.mrb[12].mxu0 }
 0x53e   : > { %1199 = vrot.lane.b32.xlu1 %v1192_v9, %s2378_s19  ;;  %v1898_v10 = vpop.f32.mrb[13].mxu0 }
 0x53f   : > { %v1195_v11 = vpop.f32.mrb[14].mxu0 }
 0x540   : > { %v1899_v12 = vpop.f32.mrb[15].mxu0 }
 0x5b0   : > { %v1200_v13 = vpop.permute.xlu1 %1199 }
 0x5b1   : > { %v1202_v14 = vsel %vm978_vm3, %v1079_v3, %v1200_v13  ;;  %v1811_v3 = vld [vmem:[%s786_s8] ss:$0 sm:$0xff] }
 0x5b2   : > { %v1203_v15 = vpack.c.bf16 %v1202_v14, %v1202_v14 }
 0x5b4   : > { %1905 = vmatmul.mubr.msk.bf16.vlgmr.msra.gmra.mrb[12].mxu1 %vm818_vm2, %v1203_v15 }
 0x5b5   : > { %1924 = vmatprep.mubr.msk.bf16.mxu1 %vm2376_vm1, %v2375_v2  ;;  %1917 = vmatpush3.bf16.msra.mxu1 %v2066_v28 }
 0x5b6   : > { %1918 = vmatprep.subr.bf16.mxu1 %v2375_v2 }
 0x5b9   : > { %1919 = vmatpush3.bf16.msra.mxu1 %v2067_v29 }
 0x5ba   : > { %1920 = vmatprep.subr.bf16.mxu1 %v2375_v2 }
 0x5bd   : > { %1921 = vmatpush3.bf16.msra.mxu1 %v2068_v40 }
 0x5be   : > { %1922 = vmatprep.subr.bf16.mxu1 %v2375_v2 }
 0x5c1   : > { %1923 = vmatpush3.bf16.msra.mxu1 %v2069_v41 }
 0x687   : > { %v1257_v16 = vpop.f32.mrb[12].mxu1 }
 0x688   : > { %v1258_v17 = vadd.f32 %v1257_v16, %v2857_v5  ;;  %v1906_v18 = vpop.f32.mrb[13].mxu1  ;;  %v2065_v5 = vld [vmem:[%s3154_s20 + $0x8] sm:$0xff]  }
 0x689   : > { %v1260_v19 = vpop.f32.mrb[14].mxu1  ;;  %1911 = vmatpush3.bf16.msra.mxu0 %v2065_v5 }
 0x68a   : > { %v1907_v20 = vpop.f32.mrb[15].mxu1  ;;  %v1265_v21 = vsel %vm818_vm2, %v1258_v17, 0.0 }
 0x68b   : > { %1266 = vadd.xlane.f32.xlu1 %v1265_v21 }
 0x718   : > { %v1267_v22 = vpop.xlane.xlu1 %1266 }
 0x719   : > { %v1269_v23 = vmul.f32 0.03125, %v1267_v22 }
 0x71b   : > { %v1270_v24 = vsub.f32 %v1258_v17, %v1269_v23 }
 0x71d   : > { %v1271_v25 = vmul.f32 %v1270_v24, %v1270_v24 }
 0x71f   : > { %v1272_v26 = vsel %vm818_vm2, %v1271_v25, 0.0 }
 0x720   : > { %1273 = vadd.xlane.f32.xlu0 %v1272_v26 }
 0x7ad   : > { %v1274_v30 = vpop.xlane.xlu0 %1273 }
 0x7ae   : > { %v1275_v31 = vmul.f32 0.03125, %v1274_v30 }
 0x7b0   : > { %v1276_v32 = vadd.f32 1e-06, %v1275_v31 }
 0x7b2   : > { %2078 = vrsqrt.f32 %v1276_v32 }
 0x7bc   : > { %v2079_v33 = vpop.eup %2078 }
 0x7bd   : > { %v1278_v35 = vmul.f32 %v2079_v33, %v1270_v24 }
 0x7bf   : > { %v1285_v37 = vmul.f32 %v1799_v34, %v1278_v35 }
 0x7c1   : > { %v1292_v38 = vadd.f32 %v1800_v36, %v1285_v37 }
 0x7c3   : > { %v1293_v39 = vpack.c.bf16 %v1292_v38, %v1292_v38 }
 0x7c5   : > { %1913 = vmatmul.mubr.msk.bf16.vlgmr.msra.gmra.mrb[16].mxu0 %vm818_vm2, %v1293_v39 }
 0x898   : > { %v1354_v43 = vpop.f32.mrb[16].mxu0 }
 0x899   : > { %v1355_v44 = vadd.f32 %v1801_v42, %v1354_v43  ;;  %v1914_v45 = vpop.f32.mrb[17].mxu0 }
 0x89a   : > { %v1357_v46 = vpop.f32.mrb[18].mxu0 }
 0x89b   : > { %v1360_v47 = vmax.f32 %v1355_v44, 0.0  ;;  %v1915_v48 = vpop.f32.mrb[19].mxu0 }
 0x89d   : > { %v1361_v49 = vpack.c.bf16 %v1360_v47, %v1360_v47 }
 0x89f   : > { %1925 = vmatmul.mubr.msk.bf16.vlgmr.msra.gmra.mrb[16].mxu1 %vm1401_vm6, %v1361_v49 }
 0x972   : > { %v1439_v51 = vpop.f32.mrb[16].mxu1 }
 0x973   : > { %v1440_v52 = vadd.f32 %v1805_v50, %v1439_v51  ;;  %v1926_v2 = vpop.f32.mrb[17].mxu1 }
 0x974   : > { %v1442_v53 = vpop.f32.mrb[18].mxu1 }
 0x975   : > { %v1927_v54 = vpop.f32.mrb[19].mxu1  ;;  %v1445_v55 = vadd.f32 %v1440_v52, %v1292_v38 }
 0x977   : > { %v1448_v56 = vsel %vm818_vm2, %v1445_v55, 0.0 }
 0x978   : > { %1449 = vadd.xlane.f32.xlu0 %v1448_v56 }
 0xa05   : > { %v1450_v57 = vpop.xlane.xlu0 %1449 }
 0xa06   : > { %v1451_v58 = vmul.f32 0.03125, %v1450_v57 }
 0xa08   : > { %v1452_v59 = vsub.f32 %v1445_v55, %v1451_v58 }
 0xa0a   : > { %v1453_v60 = vmul.f32 %v1452_v59, %v1452_v59 }
 0xa0c   : > { %v1454_v61 = vsel %vm818_vm2, %v1453_v60, 0.0 }
 0xa0d   : > { %1455 = vadd.xlane.f32.xlu0 %v1454_v61 }
 0xa9a   : > { %v1456_v62 = vpop.xlane.xlu0 %1455 }
 0xa9b   : > { %v1457_v63 = vmul.f32 0.03125, %v1456_v62 }
 0xa9d   : > { %v1458_v0 = vadd.f32 1e-06, %v1457_v63 }
 0xa9f   : > { %2080 = vrsqrt.f32 %v1458_v0 }
 0xaa9   : > { %v2081_v1 = vpop.eup %2080 }
 0xaaa   : > { %v1460_v4 = vmul.f32 %v2081_v1, %v1452_v59  ;;  %1479 = sbr.rel (%p1813_p1) target bundleno = 2745 (0xab9), region = 104 }
 0xaac   : > { %v1467_v7 = vmul.f32 %v1811_v3, %v1460_v4 }
 0xaae   : > { %v1474_v8 = vadd.f32 %v1812_v6, %v1467_v7 }
 0xab0   : > { %1475 = vst.msk [vmem:[#allocation2] sm:$0xff] %vm818_vm2, %v1474_v8 }
 0xab7   : > { %v1480_v9 = vld [vmem:[#allocation2] sm:$0xff] }
 0xab8   : > { %1481 = vst.msk [vmem:[%s2847_s22] sm:$0xff] %vm818_vm2, %v1480_v9 }
 0xab9 PF: > { %s3162_s3 = sld [smem:[#allocation24_spill]]  ;;  %s3163_s8 = sld [smem:[#allocation30_spill]] }
 0xaba   : > { %s3164_s23 = sld [smem:[#allocation50_spill]]  ;;  %s1496_s13 = sshll.u32 %s2847_s22, 4  ;;  %s1497_s13 = int_to_ptr.vmem [resolvable:$true] %s1496_s13 }
 0xabb   : > { %s1483_s19 = scalar_lea.sflag [#allocation5], %s2766_s14  ;;  %s2232_s6 = scalar_lea.vmem %s1497_s13, 128 }
 0xabc   : > { %p2233_p7 = scmp.ne.s32.totalorder %s1497_s13, %s2232_s6  ;;  %s2379_s20 = smov [#allocation12]  }
 0xabd   : > { %s2236_s4 = sshll.u32 %s2379_s20, 4  ;;  %s2237_s4 = int_to_ptr.vmem [resolvable:$false] %s2236_s4 }
 0xabe   : > { %s2238_s16 = scalar_lea.vmem %s2237_s4, 256  ;;  %p2239_p8 = scmp.lt.s32.totalorder %s1497_s13, %s2237_s4 }
 0xabf   : > { %s1815_s5 = sshll.u32 %s3162_s3, 7  ;;  %p3166_p11 = scmp.ne.s32.totalorder %s3163_s8, 0 }
 0xac0   : > { %s3165_s0 = smov %s3164_s23  ;;  %s2970_s17 = scalar_lea.hbm %s3164_s23, %s1815_s5 }
 0xac1   : > { %p2234_p6 = pnand %p2233_p7, %p3166_p11  ;;  %p2240_p12 = scmp.lt.s32.totalorder %s2238_s16, %s2232_s6 }
 0xac3   : > { %p2235_p0 = pneg %p2234_p6  ;;  %p2241_p3 = por %p2240_p12, %p2239_p8 }
 0xac5   : > { %p2242_p5 = pnand %p2241_p3, %p2235_p0 }
 0xac7   : > { %2245 = shalt.err (!%p2242_p5)
}
 0xac8   : > { %s2246_s14 = scalar_lea.hbm %s2970_s17, 128  ;;  %s2250_s18 = scalar_lea.hbm %s3165_s0, 256 }
 0xac9   : > { %p2247_p13 = scmp.ne.s32.totalorder %s2970_s17, %s2246_s14  ;;  %p2251_p4 = scmp.lt.u32.totalorder %s2970_s17, %s3165_s0 }
 0xaca   : > { %p2252_p10 = scmp.lt.u32.totalorder %s2250_s18, %s2246_s14  ;;  %p2254_p7 = scmp.lt.u32.totalorder %s2246_s14, %s2970_s17 }
 0xacb   : > { %p2248_p2 = pnand %p2247_p13, %p3166_p11 }
 0xacc   : > { %p2253_p1 = por %p2252_p10, %p2251_p4 }
 0xacd   : > { %p2249_p9 = pneg %p2248_p2 }
 0xace   : > { %p2255_p6 = por %p2254_p7, %p2253_p1 }
 0xad0   : > { %p2256_p0 = pnand %p2255_p6, %p2249_p9 }
 0xad2   : > { %2259 = shalt.err (!%p2256_p0)
}
 0xad3   : > { %1938 = dma.vmem_to_hbm [thread:$0]  (%p3166_p11), %s1497_s13, 128, %s2970_s17, %s1483_s19  }
 0xad4 PF: > { %s3167_s26 = sld [smem:[#allocation27_spill]]  ;;  %s3168_s21 = sld [smem:[#allocation20_spill]] }
 0xad5   : > { %s3169_s28 = sld [smem:[#allocation31_spill]] }
 0xada   : > { %p1961_p8 = scmp.ge.s32.totalorder %s3167_s26, 2  ;;  %s1508_s12 = sand.u32 1, %s3168_s21  }
 0xadb   : > { %p3170_p12 = scmp.ne.s32.totalorder %s3169_s28, 0  ;;  %s1509_s15 = scalar_lea.sflag [#allocation5], %s1508_s12 }
 0xadd   : > { %p1957_p3 = pnand %p1961_p8, %p3170_p12 }
 0xadf   : > { %2321 = dma.done.wait (!%p1957_p3), %s1509_s15, 128  }
 0xae0   : > { %2323 = vsyncadd (!%p1957_p3), %s1509_s15, 4294967168  ;;  %s36_s23 = sadd.s32 1, %s3167_s26   ;;  %s3171_s29 = sld [smem:[#allocation18_spill]] }
 0xae1   : > { %p33_p5 = scmp.ge.s32.totalorder %s36_s23, 6   ;;  %s3172_s30 = sld [smem:[#allocation19_spill]] }
 0xae2   : > { %s3173_s15 = sld [smem:[#allocation34_spill]]  ;;  %s3174_s16 = sld [smem:[#allocation21_spill]] }
 0xae3   : > { %s3175_s17 = sld [smem:[#allocation22_spill]]  ;;  %s3176_s18 = sld [smem:[#allocation35_spill]] }
 0xae4   : > { %s3177_s19 = sld [smem:[#allocation25_spill]]  ;;  %s3178_s20 = sld [smem:[#allocation26_spill]] }
 0xae5   : > { %s3179_s21 = sld [smem:[#allocation32_spill]]  ;;  %s3180_s22 = sld [smem:[#allocation33_spill]] }
 0xae6   :  { %35 = sbr.rel (!%p33_p5) target bundleno = 29 (0x1d), region = 204 }
 0xaed   :  { %1514 = vsyncpa [#allocation4], 1 }
 0xaee   :  { %1516 = vsyncpa [#allocation4 + $0x1], 1 }
 0xaef   :  { %1517 = vsyncpa [#allocation7], 1 }
 0xaf0   :  { %1519 = vsyncpa [#allocation7 + $0x1], 1 }
 0xaf1   :  { %1520 = vsyncpa [#allocation10], 1 }
 0xaf2   :  { %1522 = vsyncpa [#allocation10 + $0x1], 1 }
 0xaf3   :  { %1523 = vsyncpa [#allocation5], 1 }
 0xaf4   :  { %1525 = vsyncpa [#allocation5 + $0x1], 1 }

</bundles_post_ra>
